<compile_context>
chip_gen: v7x
topology: tpu7x:2x2x1
jax: 0.10.0
libtpu: 0.0.40
codegen_flags: <defaults>
</compile_context>

<pallas_src>
import functools
import math

import jax
import jax.numpy as jnp
from jax import lax
from jax.experimental import pallas as pl
from jax.experimental.pallas import tpu as pltpu

# Set to jnp.float32 for a full-precision fallback (2x HBM traffic, slower MXU).
_COMPUTE_DTYPE = jnp.bfloat16


# ---------------------------------------------------------------------------
# Small helpers
# ---------------------------------------------------------------------------
def _round_up(x, m):
    return ((x + m - 1) // m) * m


def _cdiv(a, b):
    return (a + b - 1) // b


@functools.lru_cache(maxsize=1)
def _vmem_capacity_bytes():
    """Physical per-core VMEM.  Conservative default = v7x (64 MiB)."""
    try:
        cap = int(pltpu.get_tpu_info().vmem_capacity_bytes)
        if cap > 0:
            return cap
    except Exception:
        pass
    return 64 << 20


def _should_fuse(k_pad, cout_pad, r_pad, force_two_stage):
    """Fuse X@(W1^T U^T) into one matmul only when it does no more (padded)
    MXU work than the two-stage rank-r path.  Generation independent because it
    never selects the higher-FLOP option (addresses the v5e concern)."""
    if force_two_stage:
        return False
    return k_pad * cout_pad <= r_pad * (k_pad + cout_pad)


# ---------------------------------------------------------------------------
# Pallas kernels
# ---------------------------------------------------------------------------
def _direct_fused_kernel(x_ref, w_ref, b_ref, o_ref, acc_ref, *, k1, k2,
                         row_stride):
    """Stride-1 conv as k1*k2 shifted matmuls (in-kernel im2col replacement).

    x_ref  : (HW_ext, C)     bf16  flattened padded NHWC image (+ k2-1 tail rows)
    w_ref  : (k1*k2, C, tn)  bf16  fused weight, q = ki*k2 + kj
    b_ref  : (1, tn)         f32
    o_ref  : (m_rows, tn)    out dtype, m_rows = H_out * W_pad ("wide" rows)
    acc_ref: (m_rows, tn)    f32 scratch accumulator
    """
    m_rows = o_ref.shape[0]
    for ki in range(k1):
        for kj in range(k2):
            q = ki * k2 + kj
            slab = x_ref[pl.ds(ki * row_stride + kj, m_rows), :]
            part = jnp.dot(slab, w_ref[q], preferred_element_type=jnp.float32)
            if q == 0:
                acc_ref[...] = part
            else:
                acc_ref[...] += part
    o_ref[...] = (acc_ref[...] + b_ref[...]).astype(o_ref.dtype)


def _direct_two_stage_kernel(x_ref, w1_ref, w2_ref, b_ref, o_ref, h_ref, *,
                             k1, k2, row_stride):
    """Same shifted-matmul conv, but keeping the rank-r split (used only when it
    reduces MXU work):  h = conv1(x)  (f32 scratch),  out = h @ U^T + b."""
    m_rows = o_ref.shape[0]
    for ki in range(k1):
        for kj in range(k2):
            q = ki * k2 + kj
            slab = x_ref[pl.ds(ki * row_stride + kj, m_rows), :]
            part = jnp.dot(slab, w1_ref[q], preferred_element_type=jnp.float32)
            if q == 0:
                h_ref[...] = part
            else:
                h_ref[...] += part
    acc = jnp.dot(h_ref[...].astype(w2_ref.dtype), w2_ref[...],
                  preferred_element_type=jnp.float32)
    o_ref[...] = (acc + b_ref[...]).astype(o_ref.dtype)


def _matmul_bias_kernel(x_ref, w_ref, b_ref, o_ref):
    acc = jnp.dot(x_ref[...], w_ref[...], preferred_element_type=jnp.float32)
    o_ref[...] = (acc + b_ref[...]).astype(o_ref.dtype)


def _two_stage_matmul_kernel(x_ref, w1_ref, w2_ref, b_ref, o_ref):
    h = jnp.dot(x_ref[...], w1_ref[...], preferred_element_type=jnp.float32)
    acc = jnp.dot(h.astype(w2_ref.dtype), w2_ref[...],
                  preferred_element_type=jnp.float32)
    o_ref[...] = (acc + b_ref[...]).astype(o_ref.dtype)


# ---------------------------------------------------------------------------
# Plain-JAX glue (weight reordering / fallback im2col)
# ---------------------------------------------------------------------------
def _reorder_k_rows(w_kx, C, k1, k2):
    """Rows ordered (c, ki, kj) (torch flatten order) -> (ki, kj, c) order."""
    K, X = w_kx.shape
    return w_kx.reshape(C, k1, k2, X).transpose(1, 2, 0, 3).reshape(K, X)


def _fused_weight_f32(w1_flat, w2, C, k1, k2):
    """W1^T @ U^T in f32, rows reordered to (ki, kj, c).  Cast to bf16 once,
    at the call site (keeps the fused product at full precision)."""
    wf = jnp.matmul(w1_flat.T.astype(jnp.float32), w2.T.astype(jnp.float32))
    return _reorder_k_rows(wf, C, k1, k2)                      # (K, Cout) f32


def _im2col_nhwc(x_nchw, k1, k2, stride, padding, k_pad, compute_dtype):
    """Patch matrix (M, k_pad), columns ordered (ki, kj, c); the K zero-pad is
    folded into the single concatenate so the big matrix is built exactly once.
    Used only for strided convs / oversized images (fallback path)."""
    N, C, H, W = x_nchw.shape
    sh, sw = stride
    ph, pw = padding
    H_out = (H + 2 * ph - k1) // sh + 1
    W_out = (W + 2 * pw - k2) // sw + 1
    x = jnp.transpose(x_nchw, (0, 2, 3, 1)).astype(compute_dtype)      # NHWC
    x = jnp.pad(x, ((0, 0), (ph, ph), (pw, pw), (0, 0)))
    cols = [
        x[:, ki:ki + sh * H_out:sh, kj:kj + sw * W_out:sw, :]
        for ki in range(k1) for kj in range(k2)
    ]
    K = C * k1 * k2
    if k_pad > K:
        cols.append(jnp.zeros((N, H_out, W_out, k_pad - K), compute_dtype))
    patches = jnp.concatenate(cols, axis=-1)                  # (N,Ho,Wo,k_pad)
    return patches.reshape(N * H_out * W_out, k_pad), H_out, W_out


# ---------------------------------------------------------------------------
# VMEM planning (honest accounting, generation aware via _vmem_capacity_bytes)
# ---------------------------------------------------------------------------
def _plan_direct(fuse, hw_ext, C, m_rows, KK, cout_pad, r_pad, out_itemsize,
                 budget):
    """Pick tn for the direct (stride-1) path, or (None, 0) if it can't fit."""
    x_b = hw_ext * C * 2                    # bf16 image block
    slab_b = m_rows * C * 2                 # transient shifted-slab copy
    if fuse:
        tn = min(cout_pad, 512)
        while tn >= 128:
            if cout_pad % tn == 0:
                need = (2 * x_b + slab_b
                        + 2 * KK * C * tn * 2            # dbl-buffered weights
                        + 2 * m_rows * tn * out_itemsize  # dbl-buffered output
                        + 2 * m_rows * tn * 4             # f32 acc + matmul temp
                        + 2 * tn * 4)                     # bias
                if need <= budget:
                    return tn, need
            tn -= 128
        return None, 0
    need = (2 * x_b + slab_b
            + 2 * (KK * C * r_pad + r_pad * cout_pad) * 2
            + 2 * m_rows * cout_pad * out_itemsize
            + 2 * m_rows * r_pad * 4                      # h scratch + temp
            + m_rows * r_pad * 2                          # bf16 copy of h
            + m_rows * cout_pad * 4                       # 2nd-matmul f32 result
            + 2 * cout_pad * 4)
    if need <= budget:
        return cout_pad, need
    return None, 0


def _plan_im2col(fuse, M, k_pad, cout_pad, r_pad, out_itemsize, budget):
    """Pick (tm, tn) for the im2col fallback.  No forced minimum step count;
    just the largest lane-dense tiles that fit the budget."""
    if fuse:
        tn = min(cout_pad, 512)
        while cout_pad % tn:
            tn -= 128
        fixed = 2 * k_pad * tn * 2 + 2 * tn * 4
        per_row = 2 * k_pad * 2 + 2 * tn * out_itemsize + tn * 4
    else:
        tn = cout_pad
        fixed = 2 * (k_pad * r_pad + r_pad * cout_pad) * 2 + 2 * cout_pad * 4
        per_row = (2 * k_pad * 2 + 2 * cout_pad * out_itemsize
                   + r_pad * 4 + r_pad * 2 + cout_pad * 4)
    avail = max(budget - fixed, 128 * per_row)
    tm = (avail // per_row) // 128 * 128
    tm = int(max(128, min(tm, 2048, _round_up(M, 128))))
    need = fixed + tm * per_row
    return tm, tn, need


# ---------------------------------------------------------------------------
# Forward pass
# ---------------------------------------------------------------------------
@functools.partial(
    jax.jit,
    static_argnames=("k1", "k2", "stride", "padding", "out_format", "out_dtype",
                     "force_two_stage"))
def decomposed_conv2d_forward(x, w1_flat, w2, bias, *, k1, k2, stride=(1, 1),
                              padding=(0, 0), out_format="NCHW", out_dtype=None,
                              force_two_stage=False):
    """x: (N, C_in, H, W).  w1_flat: (r, C_in*k1*k2) = diag(S) @ V_t.
    w2: (C_out, r) = U.  bias: (C_out,).
    Returns NCHW (default, drop-in) or NHWC (cheaper: skips the final transpose)."""
    N, C, H, W = x.shape
    r, K = w1_flat.shape
    Cout = w2.shape[0]
    assert K == C * k1 * k2
    sh, sw = stride
    ph, pw = padding
    H_out = (H + 2 * ph - k1) // sh + 1
    W_out = (W + 2 * pw - k2) // sw + 1
    assert H_out > 0 and W_out > 0

    out_dt = x.dtype if out_dtype is None else jnp.dtype(out_dtype)
    out_itemsize = jnp.dtype(out_dt).itemsize
    KK = k1 * k2
    K_pad = _round_up(K, 128)
    Cout_pad = _round_up(Cout, 128)
    R_pad = _round_up(r, 128)
    fuse = _should_fuse(K_pad, Cout_pad, R_pad, force_two_stage)

    cap = _vmem_capacity_bytes()
    budget = (cap * 11) // 16            # ~0.69 of physical VMEM (v7x-safe)

    bias2d = jnp.pad(bias.astype(jnp.float32),
                     (0, Cout_pad - Cout)).reshape(1, Cout_pad)

    tn = None
    if sh == 1 and sw == 1:
        H_pad, W_pad = H + 2 * ph, W + 2 * pw
        m_rows = H_out * W_pad            # includes k2-1 discarded "wide" columns
        hw_ext = H_pad * W_pad + (k2 - 1)  # tail rows so the last shift stays in range
        tn, need = _plan_direct(fuse, hw_ext, C, m_rows, KK, Cout_pad, R_pad,
                                out_itemsize, budget)

    if tn is not None:
        # ---- direct shift-and-matmul path (stride 1): no im2col at all -------
        x_nhwc = jnp.transpose(x, (0, 2, 3, 1)).astype(_COMPUTE_DTYPE)
        x_sp = jnp.pad(x_nhwc, ((0, 0), (ph, ph), (pw, pw), (0, 0)))
        x_flat = x_sp.reshape(N, H_pad * W_pad, C)
        if k2 > 1:
            x_flat = jnp.pad(x_flat, ((0, 0), (0, k2 - 1), (0, 0)))

        if fuse:
            wf = _fused_weight_f32(w1_flat, w2, C, k1, k2)        # (K, Cout) f32
            w_op = jnp.pad(wf, ((0, 0), (0, Cout_pad - Cout)))
            w_op = w_op.reshape(KK, C, Cout_pad).astype(_COMPUTE_DTYPE)
            kernel = functools.partial(_direct_fused_kernel, k1=k1, k2=k2,
                                       row_stride=W_pad)
            operands = (x_flat, w_op, bias2d)
            grid = (N, Cout_pad // tn)
            in_specs = [
                pl.BlockSpec((None, hw_ext, C), lambda n, j: (n, 0, 0)),
                pl.BlockSpec((KK, C, tn), lambda n, j: (0, 0, j)),
                pl.BlockSpec((1, tn), lambda n, j: (0, j)),
            ]
            out_specs = pl.BlockSpec((None, m_rows, tn), lambda n, j: (n, 0, j))
            scratch = [pltpu.VMEM((m_rows, tn), jnp.float32)]
            dim_sem = ("parallel", "parallel")
            flops = 2 * N * m_rows * C * Cout_pad * KK
            bytes_accessed = (N * hw_ext * C * 2 + KK * C * Cout_pad * 2
                              + N * m_rows * Cout_pad * out_itemsize)
        else:
            w1_re = _reorder_k_rows(w1_flat.T.astype(jnp.float32), C, k1, k2)
            w1_op = jnp.pad(w1_re, ((0, 0), (0, R_pad - r)))
            w1_op = w1_op.reshape(KK, C, R_pad).astype(_COMPUTE_DTYPE)
            w2_op = jnp.pad(w2.T.astype(jnp.float32),
                            ((0, R_pad - r), (0, Cout_pad - Cout)))
            w2_op = w2_op.astype(_COMPUTE_DTYPE)
            kernel = functools.partial(_direct_two_stage_kernel, k1=k1, k2=k2,
                                       row_stride=W_pad)
            operands = (x_flat, w1_op, w2_op, bias2d)
            grid = (N,)
            in_specs = [
                pl.BlockSpec((None, hw_ext, C), lambda n: (n, 0, 0)),
                pl.BlockSpec((KK, C, R_pad), lambda n: (0, 0, 0)),
                pl.BlockSpec((R_pad, Cout_pad), lambda n: (0, 0)),
                pl.BlockSpec((1, Cout_pad), lambda n: (0, 0)),
            ]
            out_specs = pl.BlockSpec((None, m_rows, Cout_pad), lambda n: (n, 0, 0))
            scratch = [pltpu.VMEM((m_rows, R_pad), jnp.float32)]
            dim_sem = ("parallel",)
            flops = 2 * N * m_rows * (C * R_pad * KK + R_pad * Cout_pad)
            bytes_accessed = (N * hw_ext * C * 2
                              + (KK * C * R_pad + R_pad * Cout_pad) * 2
                              + N * m_rows * Cout_pad * out_itemsize)

        vmem_limit = int(min(cap - (4 << 20), max(need + (8 << 20), 32 << 20)))
        out_wide = pl.pallas_call(
            kernel,
            out_shape=jax.ShapeDtypeStruct((N, m_rows, Cout_pad), out_dt),
            grid_spec=pltpu.PrefetchScalarGridSpec(
                num_scalar_prefetch=0, grid=grid, in_specs=in_specs,
                out_specs=out_specs, scratch_shapes=scratch),
            compiler_params=pltpu.CompilerParams(
                dimension_semantics=dim_sem,
                vmem_limit_bytes=vmem_limit,
                allow_input_fusion=[True] + [False] * (len(operands) - 1)),
            cost_estimate=pl.CostEstimate(flops=int(flops), transcendentals=0,
                                          bytes_accessed=int(bytes_accessed)),
        )(*operands)
        out = out_wide.reshape(N, H_out, W_pad, Cout_pad)[:, :, :W_out, :Cout]
    else:
        # ---- im2col fallback (strided convs / images too big for one block) --
        patches, _, _ = _im2col_nhwc(x, k1, k2, stride, padding, K_pad,
                                     _COMPUTE_DTYPE)
        M = patches.shape[0]
        tm, tn2, need = _plan_im2col(fuse, M, K_pad, Cout_pad, R_pad,
                                     out_itemsize, budget)
        if fuse:
            wf = _fused_weight_f32(w1_flat, w2, C, k1, k2)
            w_op = jnp.pad(wf, ((0, K_pad - K), (0, Cout_pad - Cout)))
            w_op = w_op.astype(_COMPUTE_DTYPE)
            kernel = _matmul_bias_kernel
            operands = (patches, w_op, bias2d)
            grid = (_cdiv(M, tm), Cout_pad // tn2)
            in_specs = [
                pl.BlockSpec((tm, K_pad), lambda i, j: (i, 0)),
                pl.BlockSpec((K_pad, tn2), lambda i, j: (0, j)),
                pl.BlockSpec((1, tn2), lambda i, j: (0, j)),
            ]
            out_specs = pl.BlockSpec((tm, tn2), lambda i, j: (i, j))
            dim_sem = ("parallel", "parallel")
            flops = 2 * M * K_pad * Cout_pad
            bytes_accessed = (M * K_pad * 2 + K_pad * Cout_pad * 2
                              + M * Cout_pad * out_itemsize)
        else:
            w1t = _reorder_k_rows(w1_flat.T.astype(jnp.float32), C, k1, k2)
            w1t = jnp.pad(w1t, ((0, K_pad - K), (0, R_pad - r)))
            w1t = w1t.astype(_COMPUTE_DTYPE)
            w2t = jnp.pad(w2.T.astype(jnp.float32),
                          ((0, R_pad - r), (0, Cout_pad - Cout)))
            w2t = w2t.astype(_COMPUTE_DTYPE)
            kernel = _two_stage_matmul_kernel
            operands = (patches, w1t, w2t, bias2d)
            grid = (_cdiv(M, tm),)
            in_specs = [
                pl.BlockSpec((tm, K_pad), lambda i: (i, 0)),
                pl.BlockSpec((K_pad, R_pad), lambda i: (0, 0)),
                pl.BlockSpec((R_pad, Cout_pad), lambda i: (0, 0)),
                pl.BlockSpec((1, Cout_pad), lambda i: (0, 0)),
            ]
            out_specs = pl.BlockSpec((tm, Cout_pad), lambda i: (i, 0))
            dim_sem = ("parallel",)
            flops = 2 * M * (K_pad * R_pad + R_pad * Cout_pad)
            bytes_accessed = (M * K_pad * 2
                              + (K_pad * R_pad + R_pad * Cout_pad) * 2
                              + M * Cout_pad * out_itemsize)

        vmem_limit = int(min(cap - (4 << 20), max(need + (8 << 20), 32 << 20)))
        out_flat = pl.pallas_call(
            kernel,
            out_shape=jax.ShapeDtypeStruct((M, Cout_pad), out_dt),
            grid_spec=pltpu.PrefetchScalarGridSpec(
                num_scalar_prefetch=0, grid=grid, in_specs=in_specs,
                out_specs=out_specs),
            compiler_params=pltpu.CompilerParams(
                dimension_semantics=dim_sem,
                vmem_limit_bytes=vmem_limit,
                allow_input_fusion=[True] + [False] * (len(operands) - 1)),
            cost_estimate=pl.CostEstimate(flops=int(flops), transcendentals=0,
                                          bytes_accessed=int(bytes_accessed)),
        )(*operands)
        out = out_flat[:, :Cout].reshape(N, H_out, W_out, Cout)

    if out_format == "NCHW":
        out = jnp.transpose(out, (0, 3, 1, 2))
    return out


# ---------------------------------------------------------------------------
# Parameter setup (plain JAX): mirrors DecomposedConv2d.compute_decomposition.
# ---------------------------------------------------------------------------
def build_decomposed_params(key, c_in, c_out, k1, k2, svd_sparsity):
    kw, kb = jax.random.split(key)
    fan_in = c_in * k1 * k2
    bound = 1.0 / math.sqrt(fan_in)
    W = jax.random.uniform(kw, (c_out, c_in, k1, k2), jnp.float32, -bound, bound)
    b = jax.random.uniform(kb, (c_out,), jnp.float32, -bound, bound)

    W_flat = W.reshape(c_out, fan_in)                        # (n, m)
    U, S, V_t = jnp.linalg.svd(W_flat, full_matrices=False)
    r = max(1, int((1.0 - svd_sparsity) * S.shape[0]))
    U, S, V_t = U[:, :r], S[:r], V_t[:r, :]

    w1_flat = jnp.matmul(jnp.diag(S), V_t)                   # first conv weight (r, K)
    w2 = U                                                   # second 1x1 weight (c_out, r)
    return w1_flat, w2, b, r


def _reference_forward(x, w1_flat, w2, bias, k1, k2, stride, padding):
    """Plain-JAX f32 reference of the two-conv composition."""
    r, K = w1_flat.shape
    C = x.shape[1]
    Cout = w2.shape[0]
    ph, pw = padding
    W1 = w1_flat.reshape(r, C, k1, k2)
    W2 = w2.reshape(Cout, r, 1, 1)
    h = lax.conv_general_dilated(
        x, W1, window_strides=stride, padding=[(ph, ph), (pw, pw)],
        dimension_numbers=("NCHW", "OIHW", "NCHW"))
    out = lax.conv_general_dilated(
        h, W2, window_strides=(1, 1), padding=[(0, 0), (0, 0)],
        dimension_numbers=("NCHW", "OIHW", "NCHW"))
    return out + bias[None, :, None, None]


if __name__ == "__main__":
    # Small, deterministic example consistent with the module.
    N, C_in, H, W = 2, 4, 16, 16
    C_out, K1, K2 = 8, 3, 3
    svd_sparsity = 0.5

    key = jax.random.PRNGKey(0)
    kx, kp = jax.random.split(key)
    x = jax.random.normal(kx, (N, C_in, H, W), jnp.float32)
    w1_flat, w2, b, r = build_decomposed_params(kp, C_in, C_out, K1, K2,
                                                svd_sparsity)

    # Case 1: stride 1 -> in-kernel direct conv, FLOP-chosen (fused) kernel.
    ref1 = _reference_forward(x, w1_flat, w2, b, K1, K2, (1, 1), (1, 1))
    out1 = decomposed_conv2d_forward(x, w1_flat, w2, b, k1=K1, k2=K2,
                                     stride=(1, 1), padding=(1, 1))
    out1 = jax.block_until_ready(out1)
    assert out1.shape == (N, C_out, H, W)
    assert jnp.allclose(out1, ref1, atol=5e-2, rtol=5e-2), float(
        jnp.max(jnp.abs(out1 - ref1)))

    # Case 2: force the two-stage (rank-reduced) direct kernel.
    out2 = decomposed_conv2d_forward(x, w1_flat, w2, b, k1=K1, k2=K2,
                                     stride=(1, 1), padding=(1, 1),
                                     force_two_stage=True)
    out2 = jax.block_until_ready(out2)
    assert jnp.allclose(out2, ref1, atol=5e-2, rtol=5e-2)

    # Case 3: stride 2 -> im2col fallback, fused matmul kernel.
    ref3 = _reference_forward(x, w1_flat, w2, b, K1, K2, (2, 2), (1, 1))
    out3 = decomposed_conv2d_forward(x, w1_flat, w2, b, k1=K1, k2=K2,
                                     stride=(2, 2), padding=(1, 1))
    out3 = jax.block_until_ready(out3)
    assert out3.shape == ref3.shape
    assert jnp.allclose(out3, ref3, atol=5e-2, rtol=5e-2)

    # Case 4: stride 2, two-stage im2col kernel.
    out4 = decomposed_conv2d_forward(x, w1_flat, w2, b, k1=K1, k2=K2,
                                     stride=(2, 2), padding=(1, 1),
                                     force_two_stage=True)
    out4 = jax.block_until_ready(out4)
    assert jnp.allclose(out4, ref3, atol=5e-2, rtol=5e-2)

    # Case 5: NHWC + bf16 output (skips the NCHW transpose and the f32 store).
    out5 = decomposed_conv2d_forward(x, w1_flat, w2, b, k1=K1, k2=K2,
                                     stride=(1, 1), padding=(1, 1),
                                     out_format="NHWC", out_dtype=jnp.bfloat16)
    out5 = jax.block_until_ready(out5)
    assert out5.shape == (N, H, W, C_out)
    assert out5.dtype == jnp.dtype(jnp.bfloat16)
    assert jnp.allclose(out5.astype(jnp.float32),
                        jnp.transpose(ref1, (0, 2, 3, 1)), atol=7e-2, rtol=7e-2)

    print("KERNEL_OK")
</pallas_src>

<mosaic_0001>
module attributes {stable_mosaic.version = 11 : i64} {
  func.func @_direct_fused_kernel(%arg0: i32, %arg1: i32, %arg2: memref<1x326x4xbf16, #tpu.memory_space<vmem>>, %arg3: memref<9x4x128xbf16, #tpu.memory_space<vmem>>, %arg4: memref<1x128xf32, #tpu.memory_space<vmem>>, %arg5: memref<1x288x128xf32, #tpu.memory_space<vmem>>, %arg6: memref<288x128xf32, #tpu.memory_space<vmem>>) attributes {dimension_semantics = [#tpu.dimension_semantics<parallel>, #tpu.dimension_semantics<parallel>], iteration_bounds = array<i64: 2, 1>, scalar_prefetch = 0 : i64, scratch_operands = 1 : i64, tpu.core_type = #tpu.core_type<tc>, window_params = [{transform_indices = @transform_0, window_bounds = array<i64: 1, 326, 4>}, {transform_indices = @transform_1, window_bounds = array<i64: 9, 4, 128>}, {transform_indices = @transform_2, window_bounds = array<i64: 1, 128>}, {transform_indices = @transform_3, window_bounds = array<i64: 1, 288, 128>}]} {
    %c0 = arith.constant 0 : index
    %c0_0 = arith.constant 0 : index
    %c0_1 = arith.constant 0 : index
    %0 = vector.load %arg2[%c0, %c0_0, %c0_1] : memref<1x326x4xbf16, #tpu.memory_space<vmem>>, vector<1x288x4xbf16>
    %1 = vector.shape_cast %0 : vector<1x288x4xbf16> to vector<288x4xbf16>
    %c0_2 = arith.constant 0 : index
    %c0_3 = arith.constant 0 : index
    %c0_4 = arith.constant 0 : index
    %2 = vector.load %arg3[%c0_2, %c0_3, %c0_4] : memref<9x4x128xbf16, #tpu.memory_space<vmem>>, vector<1x4x128xbf16>
    %3 = vector.shape_cast %2 : vector<1x4x128xbf16> to vector<4x128xbf16>
    %cst = arith.constant dense<0.000000e+00> : vector<288x128xf32>
    %4 = tpu.matmul %1, %3, %cst {dimension_numbers = #tpu.dot_dimension_numbers<[1], [0], [0], [1], [0, 0, 1, 1], [], []>} : vector<288x4xbf16>, vector<4x128xbf16>, vector<288x128xf32> -> vector<288x128xf32>
    %c0_5 = arith.constant 0 : index
    %c0_6 = arith.constant 0 : index
    %5 = vector.load %arg6[%c0_5, %c0_6] : memref<288x128xf32, #tpu.memory_space<vmem>>, vector<288x128xf32>
    tpu.vector_store %arg6[%c0_5, %c0_6], %4 {strides = array<i32>} : memref<288x128xf32, #tpu.memory_space<vmem>>, vector<288x128xf32>,
    %c0_7 = arith.constant 0 : index
    %c1 = arith.constant 1 : index
    %c0_8 = arith.constant 0 : index
    %6 = vector.load %arg2[%c0_7, %c1, %c0_8] : memref<1x326x4xbf16, #tpu.memory_space<vmem>>, vector<1x288x4xbf16>
    %7 = vector.shape_cast %6 : vector<1x288x4xbf16> to vector<288x4xbf16>
    %c1_9 = arith.constant 1 : index
    %c0_10 = arith.constant 0 : index
    %c0_11 = arith.constant 0 : index
    %8 = vector.load %arg3[%c1_9, %c0_10, %c0_11] : memref<9x4x128xbf16, #tpu.memory_space<vmem>>, vector<1x4x128xbf16>
    %9 = vector.shape_cast %8 : vector<1x4x128xbf16> to vector<4x128xbf16>
    %cst_12 = arith.constant dense<0.000000e+00> : vector<288x128xf32>
    %10 = tpu.matmul %7, %9, %cst_12 {dimension_numbers = #tpu.dot_dimension_numbers<[1], [0], [0], [1], [0, 0, 1, 1], [], []>} : vector<288x4xbf16>, vector<4x128xbf16>, vector<288x128xf32> -> vector<288x128xf32>
    %c0_13 = arith.constant 0 : index
    %c0_14 = arith.constant 0 : index
    %11 = vector.load %arg6[%c0_13, %c0_14] : memref<288x128xf32, #tpu.memory_space<vmem>>, vector<288x128xf32>
    %12 = arith.addf %11, %10 : vector<288x128xf32>
    %c0_15 = arith.constant 0 : index
    %c0_16 = arith.constant 0 : index
    %13 = vector.load %arg6[%c0_15, %c0_16] : memref<288x128xf32, #tpu.memory_space<vmem>>, vector<288x128xf32>
    tpu.vector_store %arg6[%c0_15, %c0_16], %12 {strides = array<i32>} : memref<288x128xf32, #tpu.memory_space<vmem>>, vector<288x128xf32>,
    %c0_17 = arith.constant 0 : index
    %c2 = arith.constant 2 : index
    %c0_18 = arith.constant 0 : index
    %14 = vector.load %arg2[%c0_17, %c2, %c0_18] : memref<1x326x4xbf16, #tpu.memory_space<vmem>>, vector<1x288x4xbf16>
    %15 = vector.shape_cast %14 : vector<1x288x4xbf16> to vector<288x4xbf16>
    %c2_19 = arith.constant 2 : index
    %c0_20 = arith.constant 0 : index
    %c0_21 = arith.constant 0 : index
    %16 = vector.load %arg3[%c2_19, %c0_20, %c0_21] : memref<9x4x128xbf16, #tpu.memory_space<vmem>>, vector<1x4x128xbf16>
    %17 = vector.shape_cast %16 : vector<1x4x128xbf16> to vector<4x128xbf16>
    %cst_22 = arith.constant dense<0.000000e+00> : vector<288x128xf32>
    %18 = tpu.matmul %15, %17, %cst_22 {dimension_numbers = #tpu.dot_dimension_numbers<[1], [0], [0], [1], [0, 0, 1, 1], [], []>} : vector<288x4xbf16>, vector<4x128xbf16>, vector<288x128xf32> -> vector<288x128xf32>
    %c0_23 = arith.constant 0 : index
    %c0_24 = arith.constant 0 : index
    %19 = vector.load %arg6[%c0_23, %c0_24] : memref<288x128xf32, #tpu.memory_space<vmem>>, vector<288x128xf32>
    %20 = arith.addf %19, %18 : vector<288x128xf32>
    %c0_25 = arith.constant 0 : index
    %c0_26 = arith.constant 0 : index
    %21 = vector.load %arg6[%c0_25, %c0_26] : memref<288x128xf32, #tpu.memory_space<vmem>>, vector<288x128xf32>
    tpu.vector_store %arg6[%c0_25, %c0_26], %20 {strides = array<i32>} : memref<288x128xf32, #tpu.memory_space<vmem>>, vector<288x128xf32>,
    %c0_27 = arith.constant 0 : index
    %c18 = arith.constant 18 : index
    %c0_28 = arith.constant 0 : index
    %22 = vector.load %arg2[%c0_27, %c18, %c0_28] : memref<1x326x4xbf16, #tpu.memory_space<vmem>>, vector<1x288x4xbf16>
    %23 = vector.shape_cast %22 : vector<1x288x4xbf16> to vector<288x4xbf16>
    %c3 = arith.constant 3 : index
    %c0_29 = arith.constant 0 : index
    %c0_30 = arith.constant 0 : index
    %24 = vector.load %arg3[%c3, %c0_29, %c0_30] : memref<9x4x128xbf16, #tpu.memory_space<vmem>>, vector<1x4x128xbf16>
    %25 = vector.shape_cast %24 : vector<1x4x128xbf16> to vector<4x128xbf16>
    %cst_31 = arith.constant dense<0.000000e+00> : vector<288x128xf32>
    %26 = tpu.matmul %23, %25, %cst_31 {dimension_numbers = #tpu.dot_dimension_numbers<[1], [0], [0], [1], [0, 0, 1, 1], [], []>} : vector<288x4xbf16>, vector<4x128xbf16>, vector<288x128xf32> -> vector<288x128xf32>
    %c0_32 = arith.constant 0 : index
    %c0_33 = arith.constant 0 : index
    %27 = vector.load %arg6[%c0_32, %c0_33] : memref<288x128xf32, #tpu.memory_space<vmem>>, vector<288x128xf32>
    %28 = arith.addf %27, %26 : vector<288x128xf32>
    %c0_34 = arith.constant 0 : index
    %c0_35 = arith.constant 0 : index
    %29 = vector.load %arg6[%c0_34, %c0_35] : memref<288x128xf32, #tpu.memory_space<vmem>>, vector<288x128xf32>
    tpu.vector_store %arg6[%c0_34, %c0_35], %28 {strides = array<i32>} : memref<288x128xf32, #tpu.memory_space<vmem>>, vector<288x128xf32>,
    %c0_36 = arith.constant 0 : index
    %c19 = arith.constant 19 : index
    %c0_37 = arith.constant 0 : index
    %30 = vector.load %arg2[%c0_36, %c19, %c0_37] : memref<1x326x4xbf16, #tpu.memory_space<vmem>>, vector<1x288x4xbf16>
    %31 = vector.shape_cast %30 : vector<1x288x4xbf16> to vector<288x4xbf16>
    %c4 = arith.constant 4 : index
    %c0_38 = arith.constant 0 : index
    %c0_39 = arith.constant 0 : index
    %32 = vector.load %arg3[%c4, %c0_38, %c0_39] : memref<9x4x128xbf16, #tpu.memory_space<vmem>>, vector<1x4x128xbf16>
    %33 = vector.shape_cast %32 : vector<1x4x128xbf16> to vector<4x128xbf16>
    %cst_40 = arith.constant dense<0.000000e+00> : vector<288x128xf32>
    %34 = tpu.matmul %31, %33, %cst_40 {dimension_numbers = #tpu.dot_dimension_numbers<[1], [0], [0], [1], [0, 0, 1, 1], [], []>} : vector<288x4xbf16>, vector<4x128xbf16>, vector<288x128xf32> -> vector<288x128xf32>
    %c0_41 = arith.constant 0 : index
    %c0_42 = arith.constant 0 : index
    %35 = vector.load %arg6[%c0_41, %c0_42] : memref<288x128xf32, #tpu.memory_space<vmem>>, vector<288x128xf32>
    %36 = arith.addf %35, %34 : vector<288x128xf32>
    %c0_43 = arith.constant 0 : index
    %c0_44 = arith.constant 0 : index
    %37 = vector.load %arg6[%c0_43, %c0_44] : memref<288x128xf32, #tpu.memory_space<vmem>>, vector<288x128xf32>
    tpu.vector_store %arg6[%c0_43, %c0_44], %36 {strides = array<i32>} : memref<288x128xf32, #tpu.memory_space<vmem>>, vector<288x128xf32>,
    %c0_45 = arith.constant 0 : index
    %c20 = arith.constant 20 : index
    %c0_46 = arith.constant 0 : index
    %38 = vector.load %arg2[%c0_45, %c20, %c0_46] : memref<1x326x4xbf16, #tpu.memory_space<vmem>>, vector<1x288x4xbf16>
    %39 = vector.shape_cast %38 : vector<1x288x4xbf16> to vector<288x4xbf16>
    %c5 = arith.constant 5 : index
    %c0_47 = arith.constant 0 : index
    %c0_48 = arith.constant 0 : index
    %40 = vector.load %arg3[%c5, %c0_47, %c0_48] : memref<9x4x128xbf16, #tpu.memory_space<vmem>>, vector<1x4x128xbf16>
    %41 = vector.shape_cast %40 : vector<1x4x128xbf16> to vector<4x128xbf16>
    %cst_49 = arith.constant dense<0.000000e+00> : vector<288x128xf32>
    %42 = tpu.matmul %39, %41, %cst_49 {dimension_numbers = #tpu.dot_dimension_numbers<[1], [0], [0], [1], [0, 0, 1, 1], [], []>} : vector<288x4xbf16>, vector<4x128xbf16>, vector<288x128xf32> -> vector<288x128xf32>
    %c0_50 = arith.constant 0 : index
    %c0_51 = arith.constant 0 : index
    %43 = vector.load %arg6[%c0_50, %c0_51] : memref<288x128xf32, #tpu.memory_space<vmem>>, vector<288x128xf32>
    %44 = arith.addf %43, %42 : vector<288x128xf32>
    %c0_52 = arith.constant 0 : index
    %c0_53 = arith.constant 0 : index
    %45 = vector.load %arg6[%c0_52, %c0_53] : memref<288x128xf32, #tpu.memory_space<vmem>>, vector<288x128xf32>
    tpu.vector_store %arg6[%c0_52, %c0_53], %44 {strides = array<i32>} : memref<288x128xf32, #tpu.memory_space<vmem>>, vector<288x128xf32>,
    %c0_54 = arith.constant 0 : index
    %c36 = arith.constant 36 : index
    %c0_55 = arith.constant 0 : index
    %46 = vector.load %arg2[%c0_54, %c36, %c0_55] : memref<1x326x4xbf16, #tpu.memory_space<vmem>>, vector<1x288x4xbf16>
    %47 = vector.shape_cast %46 : vector<1x288x4xbf16> to vector<288x4xbf16>
    %c6 = arith.constant 6 : index
    %c0_56 = arith.constant 0 : index
    %c0_57 = arith.constant 0 : index
    %48 = vector.load %arg3[%c6, %c0_56, %c0_57] : memref<9x4x128xbf16, #tpu.memory_space<vmem>>, vector<1x4x128xbf16>
    %49 = vector.shape_cast %48 : vector<1x4x128xbf16> to vector<4x128xbf16>
    %cst_58 = arith.constant dense<0.000000e+00> : vector<288x128xf32>
    %50 = tpu.matmul %47, %49, %cst_58 {dimension_numbers = #tpu.dot_dimension_numbers<[1], [0], [0], [1], [0, 0, 1, 1], [], []>} : vector<288x4xbf16>, vector<4x128xbf16>, vector<288x128xf32> -> vector<288x128xf32>
    %c0_59 = arith.constant 0 : index
    %c0_60 = arith.constant 0 : index
    %51 = vector.load %arg6[%c0_59, %c0_60] : memref<288x128xf32, #tpu.memory_space<vmem>>, vector<288x128xf32>
    %52 = arith.addf %51, %50 : vector<288x128xf32>
    %c0_61 = arith.constant 0 : index
    %c0_62 = arith.constant 0 : index
    %53 = vector.load %arg6[%c0_61, %c0_62] : memref<288x128xf32, #tpu.memory_space<vmem>>, vector<288x128xf32>
    tpu.vector_store %arg6[%c0_61, %c0_62], %52 {strides = array<i32>} : memref<288x128xf32, #tpu.memory_space<vmem>>, vector<288x128xf32>,
    %c0_63 = arith.constant 0 : index
    %c37 = arith.constant 37 : index
    %c0_64 = arith.constant 0 : index
    %54 = vector.load %arg2[%c0_63, %c37, %c0_64] : memref<1x326x4xbf16, #tpu.memory_space<vmem>>, vector<1x288x4xbf16>
    %55 = vector.shape_cast %54 : vector<1x288x4xbf16> to vector<288x4xbf16>
    %c7 = arith.constant 7 : index
    %c0_65 = arith.constant 0 : index
    %c0_66 = arith.constant 0 : index
    %56 = vector.load %arg3[%c7, %c0_65, %c0_66] : memref<9x4x128xbf16, #tpu.memory_space<vmem>>, vector<1x4x128xbf16>
    %57 = vector.shape_cast %56 : vector<1x4x128xbf16> to vector<4x128xbf16>
    %cst_67 = arith.constant dense<0.000000e+00> : vector<288x128xf32>
    %58 = tpu.matmul %55, %57, %cst_67 {dimension_numbers = #tpu.dot_dimension_numbers<[1], [0], [0], [1], [0, 0, 1, 1], [], []>} : vector<288x4xbf16>, vector<4x128xbf16>, vector<288x128xf32> -> vector<288x128xf32>
    %c0_68 = arith.constant 0 : index
    %c0_69 = arith.constant 0 : index
    %59 = vector.load %arg6[%c0_68, %c0_69] : memref<288x128xf32, #tpu.memory_space<vmem>>, vector<288x128xf32>
    %60 = arith.addf %59, %58 : vector<288x128xf32>
    %c0_70 = arith.constant 0 : index
    %c0_71 = arith.constant 0 : index
    %61 = vector.load %arg6[%c0_70, %c0_71] : memref<288x128xf32, #tpu.memory_space<vmem>>, vector<288x128xf32>
    tpu.vector_store %arg6[%c0_70, %c0_71], %60 {strides = array<i32>} : memref<288x128xf32, #tpu.memory_space<vmem>>, vector<288x128xf32>,
    %c0_72 = arith.constant 0 : index
    %c38 = arith.constant 38 : index
    %c0_73 = arith.constant 0 : index
    %62 = vector.load %arg2[%c0_72, %c38, %c0_73] : memref<1x326x4xbf16, #tpu.memory_space<vmem>>, vector<1x288x4xbf16>
    %63 = vector.shape_cast %62 : vector<1x288x4xbf16> to vector<288x4xbf16>
    %c8 = arith.constant 8 : index
    %c0_74 = arith.constant 0 : index
    %c0_75 = arith.constant 0 : index
    %64 = vector.load %arg3[%c8, %c0_74, %c0_75] : memref<9x4x128xbf16, #tpu.memory_space<vmem>>, vector<1x4x128xbf16>
    %65 = vector.shape_cast %64 : vector<1x4x128xbf16> to vector<4x128xbf16>
    %cst_76 = arith.constant dense<0.000000e+00> : vector<288x128xf32>
    %66 = tpu.matmul %63, %65, %cst_76 {dimension_numbers = #tpu.dot_dimension_numbers<[1], [0], [0], [1], [0, 0, 1, 1], [], []>} : vector<288x4xbf16>, vector<4x128xbf16>, vector<288x128xf32> -> vector<288x128xf32>
    %c0_77 = arith.constant 0 : index
    %c0_78 = arith.constant 0 : index
    %67 = vector.load %arg6[%c0_77, %c0_78] : memref<288x128xf32, #tpu.memory_space<vmem>>, vector<288x128xf32>
    %68 = arith.addf %67, %66 : vector<288x128xf32>
    %c0_79 = arith.constant 0 : index
    %c0_80 = arith.constant 0 : index
    %69 = vector.load %arg6[%c0_79, %c0_80] : memref<288x128xf32, #tpu.memory_space<vmem>>, vector<288x128xf32>
    tpu.vector_store %arg6[%c0_79, %c0_80], %68 {strides = array<i32>} : memref<288x128xf32, #tpu.memory_space<vmem>>, vector<288x128xf32>,
    %c0_81 = arith.constant 0 : index
    %c0_82 = arith.constant 0 : index
    %70 = vector.load %arg6[%c0_81, %c0_82] : memref<288x128xf32, #tpu.memory_space<vmem>>, vector<288x128xf32>
    %c0_83 = arith.constant 0 : index
    %c0_84 = arith.constant 0 : index
    %71 = vector.load %arg4[%c0_83, %c0_84] : memref<1x128xf32, #tpu.memory_space<vmem>>, vector<1x128xf32>
    %72 = vector.broadcast %71 : vector<1x128xf32> to vector<288x128xf32>
    %73 = arith.addf %70, %72 : vector<288x128xf32>
    %c0_85 = arith.constant 0 : index
    %c0_86 = arith.constant 0 : index
    %c0_87 = arith.constant 0 : index
    %74 = vector.load %arg5[%c0_85, %c0_86, %c0_87] : memref<1x288x128xf32, #tpu.memory_space<vmem>>, vector<1x288x128xf32>
    %75 = vector.shape_cast %74 : vector<1x288x128xf32> to vector<288x128xf32>
    %76 = vector.shape_cast %73 : vector<288x128xf32> to vector<1x288x128xf32>
    tpu.vector_store %arg5[%c0_85, %c0_86, %c0_87], %76 {strides = array<i32>} : memref<1x288x128xf32, #tpu.memory_space<vmem>>, vector<1x288x128xf32>,
    return
  }
  func.func @transform_0(%arg0: i32, %arg1: i32) -> (i32, i32, i32) {
    %c0_i32 = arith.constant 0 : i32
    %c0_i32_0 = arith.constant 0 : i32
    %c0_i32_1 = arith.constant 0 : i32
    return %arg0, %c0_i32, %c0_i32_0 : i32, i32, i32
  }
  func.func @transform_1(%arg0: i32, %arg1: i32) -> (i32, i32, i32) {
    %c0_i32 = arith.constant 0 : i32
    %c0_i32_0 = arith.constant 0 : i32
    %c0_i32_1 = arith.constant 0 : i32
    return %c0_i32, %c0_i32_0, %arg1 : i32, i32, i32
  }
  func.func @transform_2(%arg0: i32, %arg1: i32) -> (i32, i32) {
    %c0_i32 = arith.constant 0 : i32
    %c0_i32_0 = arith.constant 0 : i32
    return %c0_i32, %arg1 : i32, i32
  }
  func.func @transform_3(%arg0: i32, %arg1: i32) -> (i32, i32, i32) {
    %c0_i32 = arith.constant 0 : i32
    %c0_i32_0 = arith.constant 0 : i32
    return %arg0, %c0_i32, %arg1 : i32, i32, i32
  }
}

</mosaic_0001>

<bundles_post_ra>
// kernel: decomposed_conv2d_forward.2
= control target key start
LH: loop header
LB: loop body
LE: loop exit
PB: predicated region body
PF: predicated region fallthrough
CT: control target
= control target key end

     0   :  { %s7522_s17 = smov 0   ;;  %s7524_s18 = smov 0   ;;  %s8253_s0 = inlined_call_operand.vmem [shape: bf16[9,4,128], index: 0, kind: input, shape index: {}]   ;;  %s8254_s1 = inlined_call_operand.vmem [shape: f32[1,128], index: 1, kind: input, shape index: {}]   ;;  %s8255_s2 = inlined_call_operand.vmem [shape: bf16[2,324,4], index: 2, kind: input, shape index: {}]   ;;  %s8256_s3 = inlined_call_operand.<no memory space> [shape: bf16[], index: 3, kind: input, shape index: {}]   ;;  %s8257_s4 = inlined_call_operand.vmem [shape: f32[2,288,128], index: 4, kind: output, shape index: {}]  }
   0x1   :  { %v9_v0 = vstv %s8256_s3  ;;  %s7526_s19 = smov 0  }
   0x2   :  { %v7520_v1 = vunpack.i.l.bf16 %v9_v0 }
   0x3 LB: > { %s31_s3 = sadd.s32 1, %s7485_s18  ;;  %p6070_p0 = scmp.ge.s32.totalorder %s7489_s19, 1  ;;  %s7489_s19 = sphi %s7526_s19, %s19_s19   ;;  %s7485_s18 = sphi %s7524_s18, %s8259_s18   ;;  %s7481_s17 = sphi %s7522_s17, %s8258_s17  }
   0x4   : > { %p33_p1 = scmp.ge.s32.totalorder %s31_s3, 2  ;;  %p174_p2 = scmp.lt.s32.totalorder %s7489_s19, 3 }
   0x6   : > { %s8261_s3 = smov (%p33_p1, %s31_s3), 0  ;;  %p175_p3 = pnand %p6070_p0, %p174_p2 }
   0x8   : > { %178 = sbr.rel (%p175_p3) target bundleno = 589 (0x24d), region = 32 }
   0xf   : > { %v1010_v2 = vld [vmem:[%s8253_s0] sm:$0x3]  ;;  %vm1156_vm0 = vcmask 1041408   ;;  %p208_p4 = scmp.lt.s32.totalorder %s7481_s17, 1  ;;  %v236_v3 = vlaneseq  ;;  %v6263_v5 = vld [vmem:[%s8253_s0 + $0x8] sm:$0x3] }
  0x10   : > { %7259 = vmatprep.subr.msk.bf16.mxu1 %vm1156_vm0, %v1010_v2  ;;  %v1158_v4 = vsel %vm1156_vm0, %v1010_v2, 0  ;;  %7263 = vmatprep.subr.msk.bf16.mxu0 %vm1156_vm0, %v6263_v5  ;;  %v7552_v6 = vsel %vm1156_vm0, %v6263_v5, 0  ;;  %v6301_v7 = vld [vmem:[%s8253_s0 + $0xa] sm:$0x3]  ;;  %v6149_v9 = vld [vmem:[%s8253_s0 + $0x2] sm:$0x3] }
  0x11   : > { %6628 = vmatpush3.bf16.msra.mxu1 %v1158_v4  ;;  %s8263_s17 = smov (!%p208_p4, %s7481_s17), 1  ;;  %v7558_v8 = vand.u32 127, %v236_v3  ;;  %6780 = vmatpush3.bf16.msra.mxu0 %v7552_v6  ;;  %v7577_v13 = vsel %vm1156_vm0, %v6301_v7, 0  ;;  %v7580_v14 = vsel %vm1156_vm0, %v6149_v9, 0  ;;  %v7491_v28 = vmov 0.0  }
  0x12   : > { %s7269_s28 = smul.u32 164, %s8263_s17  ;;  %7265 = vmatprep.subr.msk.bf16.mxu0 %vm1156_vm0, %v6301_v7  ;;  %7260 = vmatprep.subr.msk.bf16.mxu1 %vm1156_vm0, %v6149_v9  ;;  %vm1101_vm2 = vcmask 31744   ;;  %vm3151_vm3 = vsmask.f32 6400  ;;  %vm3796_vm4 = vcmask 1045504   ;;  %vm2128_vm7 = vcmask 1046528  }
  0x13   : > { %vm239_vm1 = vcmp.lt.s32.totalorder %v7558_v8, 4  ;;  %vm1505_vm5 = vsmask.f32 7424  ;;  %vm4819_vm8 = vsmask.f32 5376  ;;  %vm5464_vm9 = vcmask 1044480  }
  0x14   : > { %s7570_s5 = scalar_lea.vmem %s8255_s2, %s7269_s28  ;;  %s7270_s21 = smul.u32 288, %s8263_s17 }
  0x15   : > { %v228_v10 = vld [vmem:[%s7570_s5] sm:$0xff]   ;;  %v6074_v11 = vld [vmem:[%s7570_s5 + $0x8] sm:$0xff]   ;;  %v6076_v12 = vld [vmem:[%s7570_s5 + $0x10] sm:$0xff]  }
  0x16   : > { %v229_v15 = vunpack.c.l.bf16 %v228_v10  ;;  %v246_v16 = vunpack.c.h.bf16 %v228_v10  ;;  %v264_v17 = vunpack.c.l.bf16 %v6074_v11  ;;  %v282_v18 = vunpack.c.h.bf16 %v6074_v11  ;;  %v6078_v19 = vld [vmem:[%s7570_s5 + $0x18] sm:$0xff]   ;;  %v6080_v33 = vld [vmem:[%s7570_s5 + $0x20] sm:$0xff]   ;;  %v6082_v34 = vld [vmem:[%s7570_s5 + $0x28] sm:$0xff]   ;;  %s8162_s26 = scalar_lea.vmem %s8257_s4, %s7270_s21 }
  0x17   : > { %v300_v20 = vunpack.c.l.bf16 %v6076_v12  ;;  %v318_v21 = vunpack.c.h.bf16 %v6076_v12  ;;  %v336_v22 = vunpack.c.l.bf16 %v6078_v19  ;;  %v354_v23 = vunpack.c.h.bf16 %v6078_v19  ;;  %v6084_v39 = vld [vmem:[%s7570_s5 + $0x30] sm:$0xff]   ;;  %v6086_v40 = vld [vmem:[%s7570_s5 + $0x38] sm:$0xff]   ;;  %v6088_v61 = vld [vmem:[%s7570_s5 + $0x40] sm:$0xff]  }
  0x18   : > { %v240_v24 = vsel %vm239_vm1, %v229_v15, %v7520_v1  ;;  %v257_v25 = vsel %vm239_vm1, %v246_v16, %v7520_v1  ;;  %v275_v26 = vsel %vm239_vm1, %v264_v17, %v7520_v1  ;;  %v293_v27 = vsel %vm239_vm1, %v282_v18, %v7520_v1  ;;  %v6090_v62 = vld [vmem:[%s7570_s5 + $0x48] sm:$0xff]   ;;  %v6092_v5 = vld [vmem:[%s7570_s5 + $0x50] sm:$0xff]   ;;  %v6094_v7 = vld [vmem:[%s7570_s5 + $0x58] sm:$0xff]  }
  0x19   : > { %v241_v29 = vpack.c.bf16 %v7491_v28, %v240_v24  ;;  %v259_v30 = vpack.c.bf16 %v7491_v28, %v257_v25  ;;  %v277_v31 = vpack.c.bf16 %v7491_v28, %v275_v26  ;;  %v295_v32 = vpack.c.bf16 %v7491_v28, %v293_v27 }
  0x1a   : > { %v311_v35 = vsel %vm239_vm1, %v300_v20, %v7520_v1  ;;  %v329_v36 = vsel %vm239_vm1, %v318_v21, %v7520_v1  ;;  %v347_v37 = vsel %vm239_vm1, %v336_v22, %v7520_v1  ;;  %v365_v38 = vsel %vm239_vm1, %v354_v23, %v7520_v1  ;;  %v7658_v20 = vld [vmem:[%s8253_s0 + $0x4] sm:$0x3] }
  0x1b   : > { %243 = vst [vmem:[#allocation8] sm:$0xf] %v241_v29  ;;  %261 = vst [vmem:[#allocation8 + $0x4] sm:$0xf] %v259_v30  ;;  %v313_v41 = vpack.c.bf16 %v7491_v28, %v311_v35  ;;  %v331_v42 = vpack.c.bf16 %v7491_v28, %v329_v36  ;;  %v349_v43 = vpack.c.bf16 %v7491_v28, %v347_v37  ;;  %v372_v45 = vunpack.c.l.bf16 %v6080_v33  ;;  %v6096_v37 = vld [vmem:[%s7570_s5 + $0x60] sm:$0xff]  }
  0x1c   : > { %279 = vst [vmem:[#allocation8 + $0x8] sm:$0xf] %v277_v31  ;;  %297 = vst [vmem:[#allocation8 + $0xc] sm:$0xf] %v295_v32  ;;  %v367_v44 = vpack.c.bf16 %v7491_v28, %v365_v38  ;;  %v390_v46 = vunpack.c.h.bf16 %v6080_v33  ;;  %v408_v47 = vunpack.c.l.bf16 %v6082_v34  ;;  %v426_v48 = vunpack.c.h.bf16 %v6082_v34 }
  0x1d   : > { %315 = vst [vmem:[#allocation8 + $0x10] sm:$0xf] %v313_v41  ;;  %333 = vst [vmem:[#allocation8 + $0x14] sm:$0xf] %v331_v42  ;;  %v444_v49 = vunpack.c.l.bf16 %v6084_v39  ;;  %v462_v50 = vunpack.c.h.bf16 %v6084_v39  ;;  %v480_v51 = vunpack.c.l.bf16 %v6086_v40  ;;  %v498_v52 = vunpack.c.h.bf16 %v6086_v40 }
  0x1e   : > { %351 = vst [vmem:[#allocation8 + $0x18] sm:$0xf] %v349_v43  ;;  %369 = vst [vmem:[#allocation8 + $0x1c] sm:$0xf] %v367_v44  ;;  %v383_v53 = vsel %vm239_vm1, %v372_v45, %v7520_v1  ;;  %v401_v54 = vsel %vm239_vm1, %v390_v46, %v7520_v1  ;;  %v419_v55 = vsel %vm239_vm1, %v408_v47, %v7520_v1  ;;  %v516_v16 = vunpack.c.l.bf16 %v6088_v61  ;;  %v7693_v43 = vld [vmem:[%s7570_s5 + $0x68] sm:$0xff]  }
  0x1f   : > { %v437_v56 = vsel %vm239_vm1, %v426_v48, %v7520_v1  ;;  %v385_v57 = vpack.c.bf16 %v7491_v28, %v383_v53  ;;  %v403_v58 = vpack.c.bf16 %v7491_v28, %v401_v54  ;;  %v421_v59 = vpack.c.bf16 %v7491_v28, %v419_v55 }
  0x20   : > { %v439_v60 = vpack.c.bf16 %v7491_v28, %v437_v56  ;;  %v455_v63 = vsel %vm239_vm1, %v444_v49, %v7520_v1  ;;  %v473_v0 = vsel %vm239_vm1, %v462_v50, %v7520_v1  ;;  %v491_v2 = vsel %vm239_vm1, %v480_v51, %v7520_v1 }
  0x21   : > { %v509_v4 = vsel %vm239_vm1, %v498_v52, %v7520_v1  ;;  %387 = vst [vmem:[#allocation8 + $0x20] sm:$0xf] %v385_v57  ;;  %405 = vst [vmem:[#allocation8 + $0x24] sm:$0xf] %v403_v58  ;;  %v457_v9 = vpack.c.bf16 %v7491_v28, %v455_v63  ;;  %v475_v10 = vpack.c.bf16 %v7491_v28, %v473_v0  ;;  %v534_v17 = vunpack.c.h.bf16 %v6088_v61 }
  0x22   : > { %423 = vst [vmem:[#allocation8 + $0x28] sm:$0xf] %v421_v59  ;;  %441 = vst [vmem:[#allocation8 + $0x2c] sm:$0xf] %v439_v60  ;;  %v493_v11 = vpack.c.bf16 %v7491_v28, %v491_v2  ;;  %v511_v12 = vpack.c.bf16 %v7491_v28, %v509_v4  ;;  %v7296_v15 = vld [vmem:[#allocation8] sm:$0xff]   ;;  %v552_v18 = vunpack.c.l.bf16 %v6090_v62  ;;  %v570_v19 = vunpack.c.h.bf16 %v6090_v62 }
  0x23   : > { %v7297_v21 = vld [vmem:[#allocation8 + $0x8] sm:$0xff]   ;;  %459 = vst [vmem:[#allocation8 + $0x30] sm:$0xf] %v457_v9  ;;  %477 = vst [vmem:[#allocation8 + $0x34] sm:$0xf] %v475_v10  ;;  %v588_v22 = vunpack.c.l.bf16 %v6092_v5  ;;  %v606_v23 = vunpack.c.h.bf16 %v6092_v5  ;;  %v624_v24 = vunpack.c.l.bf16 %v6094_v7  ;;  %v642_v25 = vunpack.c.h.bf16 %v6094_v7  ;;  %6629 = vmatprep.mubr.msk.bf16.mxu1 %vm1101_vm2, %v7296_v15 }
  0x24   : > { %495 = vst [vmem:[#allocation8 + $0x38] sm:$0xf] %v493_v11  ;;  %513 = vst [vmem:[#allocation8 + $0x3c] sm:$0xf] %v511_v12  ;;  %v527_v26 = vsel %vm239_vm1, %v516_v16, %v7520_v1  ;;  %v545_v27 = vsel %vm239_vm1, %v534_v17, %v7520_v1  ;;  %v563_v29 = vsel %vm239_vm1, %v552_v18, %v7520_v1  ;;  %6630 = vmatmul.mubr.msk.bf16.vlgmr.msra.gmra.mrb[0].mxu1 %vm1101_vm2, %v7297_v21  ;;  %v7298_v31 = vld [vmem:[#allocation8 + $0x8] sm:$0xfe]  }
  0x25   : > { %v581_v30 = vsel %vm239_vm1, %v570_v19, %v7520_v1  ;;  %v7299_v32 = vld [vmem:[#allocation8 + $0x10] sm:$0xff]   ;;  %v529_v33 = vpack.c.bf16 %v7491_v28, %v527_v26  ;;  %v547_v34 = vpack.c.bf16 %v7491_v28, %v545_v27  ;;  %v565_v35 = vpack.c.bf16 %v7491_v28, %v563_v29  ;;  %6666 = vmatpush3.bf16.msra.mxu1 %v7580_v14  ;;  %v7301_v47 = vld [vmem:[#allocation8 + $0x18] sm:$0xff]  }
  0x26   : > { %v583_v36 = vpack.c.bf16 %v7491_v28, %v581_v30  ;;  %v7300_v38 = vld [vmem:[#allocation8 + $0x10] sm:$0xff]   ;;  %v599_v39 = vsel %vm239_vm1, %v588_v22, %v7520_v1  ;;  %v617_v40 = vsel %vm239_vm1, %v606_v23, %v7520_v1  ;;  %v635_v41 = vsel %vm239_vm1, %v624_v24, %v7520_v1  ;;  %7261 = vmatprep.subr.msk.bf16.mxu1 %vm1156_vm0, %v7658_v20  ;;  %v7302_v58 = vld [vmem:[#allocation8 + $0x18] sm:$0xff]   ;;  %v7721_v24 = vld [vmem:[%s8253_s0 + $0xc] sm:$0x3] }
  0x27   : > { %v653_v42 = vsel %vm239_vm1, %v642_v25, %v7520_v1  ;;  %v3153_v44 = vshrl.u32 %v7298_v31, 16  ;;  %v3156_v14 = vshll.u32 %v7298_v31, 16  ;;  %v3161_v45 = vshrl.u32 %v7299_v32, 16  ;;  %531 = vst [vmem:[#allocation8 + $0x40] sm:$0xf] %v529_v33  ;;  %6633 = vmatprep.mubr.msk.bf16.mxu1 %vm1101_vm2, %v7300_v38  ;;  %v6100_v18 = vld [vmem:[%s7570_s5 + $0x70] sm:$0xff]  }
  0x28   : > { %v3164_v46 = vshll.u32 %v7299_v32, 16  ;;  %549 = vst [vmem:[#allocation8 + $0x44] sm:$0xf] %v547_v34  ;;  %567 = vst [vmem:[#allocation8 + $0x48] sm:$0xf] %v565_v35  ;;  %v601_v48 = vpack.c.bf16 %v7491_v28, %v599_v39  ;;  %v619_v49 = vpack.c.bf16 %v7491_v28, %v617_v40  ;;  %v637_v50 = vpack.c.bf16 %v7491_v28, %v635_v41  ;;  %v7303_v59 = vld [vmem:[#allocation8 + $0x20] sm:$0xff]  }
  0x29   : > { %585 = vst [vmem:[#allocation8 + $0x4c] sm:$0xf] %v583_v36  ;;  %v655_v51 = vpack.c.bf16 %v7491_v28, %v653_v42  ;;  %v3155_v52 = vrot.slane %v3153_v44, 1  ;;  %v3158_v53 = vrot.slane %v3156_v14, 2  ;;  %v3163_v54 = vrot.slane %v3161_v45, 1  ;;  %v7304_v10 = vld [vmem:[#allocation8 + $0x20] sm:$0xff]  }
  0x2a   : > { %v3166_v55 = vrot.slane %v3164_v46, 2  ;;  %v3170_v56 = vshrl.u32 %v7301_v47, 16  ;;  %v3173_v57 = vshll.u32 %v7301_v47, 16  ;;  %603 = vst [vmem:[#allocation8 + $0x50] sm:$0xf] %v601_v48  ;;  %v660_v60 = vunpack.c.l.bf16 %v6096_v37  ;;  %v7305_v11 = vld [vmem:[#allocation8 + $0x28] sm:$0xff]  }
  0x2b   : > { %621 = vst [vmem:[#allocation8 + $0x54] sm:$0xf] %v619_v49  ;;  %639 = vst [vmem:[#allocation8 + $0x58] sm:$0xf] %v637_v50  ;;  %v678_v61 = vunpack.c.h.bf16 %v6096_v37  ;;  %v3159_v62 = vor.u32 %v3158_v53, %v3155_v52  ;;  %v696_v0 = vunpack.c.l.bf16 %v7693_v43  ;;  %v714_v2 = vunpack.c.h.bf16 %v7693_v43  ;;  %v7724_v25 = vld [vmem:[%s7570_s5 + $0x78] sm:$0xff]   ;;  %v7306_v27 = vld [vmem:[#allocation8 + $0x28] sm:$0xff]  }
  0x2c   : > { %657 = vst [vmem:[#allocation8 + $0x5c] sm:$0xf] %v655_v51  ;;  %v3167_v63 = vor.u32 %v3166_v55, %v3163_v54  ;;  %v3172_v4 = vrot.slane %v3170_v56, 1  ;;  %v3175_v5 = vrot.slane %v3173_v57, 2  ;;  %v3179_v7 = vshrl.u32 %v7303_v59, 16  ;;  %6634 = vmatmul.mubr.msk.bf16.gmra.mrb[4].mxu1 %vm1101_vm2, %v7302_v58  ;;  %v7307_v29 = vld [vmem:[#allocation8 + $0x30] sm:$0xff]  }
  0x2d   : > { %v3182_v9 = vshll.u32 %v7303_v59, 16  ;;  %v671_v15 = vsel %vm239_vm1, %v660_v60, %v7520_v1  ;;  %v689_v16 = vsel %vm239_vm1, %v678_v61, %v7520_v1  ;;  %v707_v17 = vsel %vm239_vm1, %v696_v0, %v7520_v1  ;;  %6637 = vmatprep.mubr.msk.bf16.mxu1 %vm1101_vm2, %v7304_v10  ;;  %v7308_v36 = vld [vmem:[#allocation8 + $0x30] sm:$0xff]   ;;  %v7309_v41 = vld [vmem:[#allocation8 + $0x38] sm:$0xff]   ;;  %v6104_v50 = vld [vmem:[%s7570_s5 + $0x80] sm:$0xff]  }
  0x2e   : > { %v3168_v12 = vsel %vm3151_vm3, %v3159_v62, %v3167_v63  ;;  %v3176_v19 = vor.u32 %v3175_v5, %v3172_v4  ;;  %v3181_v21 = vrot.slane %v3179_v7, 1  ;;  %v3188_v23 = vshrl.u32 %v7305_v11, 16  ;;  %v6106_v7 = vld [vmem:[%s7570_s5 + $0x88] sm:$0xff]  }
  0x2f   : > { %6781 = vmatprep.mubr.msk.bf16.mxu0 %vm1101_vm2, %v3168_v12  ;;  %v3184_v22 = vrot.slane %v3182_v9, 2  ;;  %v3191_v26 = vshll.u32 %v7305_v11, 16  ;;  %v673_v30 = vpack.c.bf16 %v7491_v28, %v671_v15  ;;  %v691_v31 = vpack.c.bf16 %v7491_v28, %v689_v16  ;;  %v7311_v52 = vld [vmem:[#allocation8 + $0x40] sm:$0xff]   ;;  %v7310_v16 = vld [vmem:[#allocation8 + $0x38] sm:$0xff]  }
  0x30   : > { %v709_v32 = vpack.c.bf16 %v7491_v28, %v707_v17  ;;  %v3177_v33 = vsel %vm3151_vm3, %v3167_v63, %v3176_v19  ;;  %v3190_v35 = vrot.slane %v3188_v23, 1  ;;  %v725_v37 = vsel %vm239_vm1, %v714_v2, %v7520_v1  ;;  %v7313_v62 = vld [vmem:[#allocation8 + $0x48] sm:$0xff]   ;;  %v7312_v23 = vld [vmem:[#allocation8 + $0x40] sm:$0xff]  }
  0x31   : > { %v3185_v34 = vor.u32 %v3184_v22, %v3181_v21  ;;  %6782 = vmatmul.mubr.msk.bf16.vlgmr.msra.gmra.mrb[0].mxu0 %vm1101_vm2, %v3177_v33  ;;  %v3193_v38 = vrot.slane %v3191_v26, 2  ;;  %v3197_v39 = vshrl.u32 %v7307_v29, 16  ;;  %v3200_v40 = vshll.u32 %v7307_v29, 16  ;;  %675 = vst [vmem:[#allocation8 + $0x60] sm:$0xf] %v673_v30  ;;  %v6108_v30 = vld [vmem:[%s7570_s5 + $0x90] sm:$0xff]  }
  0x32   : > { %693 = vst [vmem:[#allocation8 + $0x64] sm:$0xf] %v691_v31  ;;  %711 = vst [vmem:[#allocation8 + $0x68] sm:$0xf] %v709_v32  ;;  %v727_v42 = vpack.c.bf16 %v7491_v28, %v725_v37  ;;  %6818 = vmatpush3.bf16.msra.mxu0 %v7577_v13  ;;  %v732_v44 = vunpack.c.l.bf16 %v6100_v18  ;;  %v750_v14 = vunpack.c.h.bf16 %v6100_v18  ;;  %v768_v45 = vunpack.c.l.bf16 %v7724_v25  ;;  %v7315_v15 = vld [vmem:[#allocation8 + $0x50] sm:$0xff]  }
  0x33   : > { %v3186_v43 = vsel %vm3151_vm3, %v3176_v19, %v3185_v34  ;;  %v3194_v46 = vor.u32 %v3193_v38, %v3190_v35  ;;  %v3199_v47 = vrot.slane %v3197_v39, 1  ;;  %v3202_v48 = vrot.slane %v3200_v40, 2  ;;  %7266 = vmatprep.subr.msk.bf16.mxu0 %vm1156_vm0, %v7721_v24 }
  0x34   : > { %6785 = vmatprep.mubr.msk.bf16.mxu0 %vm1101_vm2, %v3186_v43  ;;  %v3206_v49 = vshrl.u32 %v7309_v41, 16  ;;  %729 = vst [vmem:[#allocation8 + $0x6c] sm:$0xf] %v727_v42  ;;  %v3209_v51 = vshll.u32 %v7309_v41, 16  ;;  %v743_v13 = vsel %vm239_vm1, %v732_v44, %v7520_v1  ;;  %v761_v53 = vsel %vm239_vm1, %v750_v14, %v7520_v1  ;;  %6638 = vmatmul.mubr.msk.bf16.gmra.mrb[8].mxu1 %vm1101_vm2, %v7306_v27  ;;  %v6110_v44 = vld [vmem:[%s7570_s5 + $0x98] sm:$0xff]  }
  0x35   : > { %v779_v54 = vsel %vm239_vm1, %v768_v45, %v7520_v1  ;;  %v3195_v55 = vsel %vm3151_vm3, %v3185_v34, %v3194_v46  ;;  %v3203_v56 = vor.u32 %v3202_v48, %v3199_v47  ;;  %v745_v58 = vpack.c.bf16 %v7491_v28, %v743_v13  ;;  %6641 = vmatprep.mubr.msk.bf16.mxu1 %vm1101_vm2, %v7308_v36  ;;  %v7317_v36 = vld [vmem:[#allocation8 + $0x58] sm:$0xff]   ;;  %v7314_v48 = vld [vmem:[#allocation8 + $0x48] sm:$0xff]  }
  0x36   : > { %v3208_v57 = vrot.slane %v3206_v49, 1  ;;  %v3211_v59 = vrot.slane %v3209_v51, 2  ;;  %v3215_v60 = vshrl.u32 %v7311_v52, 16  ;;  %v3218_v61 = vshll.u32 %v7311_v52, 16  ;;  %v7316_v51 = vld [vmem:[#allocation8 + $0x50] sm:$0xff]  }
  0x37   : > { %v763_v63 = vpack.c.bf16 %v7491_v28, %v761_v53  ;;  %v3204_v0 = vsel %vm3151_vm3, %v3194_v46, %v3203_v56  ;;  %747 = vst [vmem:[#allocation8 + $0x70] sm:$0xf] %v745_v58  ;;  %v781_v2 = vpack.c.bf16 %v7491_v28, %v779_v54  ;;  %v786_v4 = vunpack.c.h.bf16 %v7724_v25  ;;  %v7320_v58 = vld [vmem:[#allocation8 + $0x10] sm:$0xff]  }
  0x38   : > { %v804_v5 = vunpack.c.l.bf16 %v6104_v50  ;;  %v3212_v9 = vor.u32 %v3211_v59, %v3208_v57  ;;  %v3217_v10 = vrot.slane %v3215_v60, 1  ;;  %v3220_v11 = vrot.slane %v3218_v61, 2 }
  0x39   : > { %v3224_v12 = vshrl.u32 %v7313_v62, 16  ;;  %765 = vst [vmem:[#allocation8 + $0x74] sm:$0xf] %v763_v63  ;;  %6786 = vmatmul.mubr.msk.bf16.gmra.mrb[4].mxu0 %vm1101_vm2, %v3195_v55  ;;  %v3227_v17 = vshll.u32 %v7313_v62, 16  ;;  %783 = vst [vmem:[#allocation8 + $0x78] sm:$0xf] %v781_v2  ;;  %v797_v18 = vsel %vm239_vm1, %v786_v4, %v7520_v1  ;;  %v822_v21 = vunpack.c.h.bf16 %v6104_v50 }
  0x3a   : > { %v815_v19 = vsel %vm239_vm1, %v804_v5, %v7520_v1  ;;  %6789 = vmatprep.mubr.msk.bf16.mxu0 %vm1101_vm2, %v3204_v0  ;;  %v3221_v22 = vor.u32 %v3220_v11, %v3217_v10  ;;  %v3233_v25 = vshrl.u32 %v7315_v15, 16  ;;  %v3236_v26 = vshll.u32 %v7315_v15, 16  ;;  %v7319_v2 = vld [vmem:[#allocation8 + $0x8] sm:$0xfc]   ;;  %v7318_v4 = vld [vmem:[#allocation8 + $0x58] sm:$0xff]  }
  0x3b   : > { %v799_v27 = vpack.c.bf16 %v7491_v28, %v797_v18  ;;  %v817_v29 = vpack.c.bf16 %v7491_v28, %v815_v19  ;;  %v833_v31 = vsel %vm239_vm1, %v822_v21, %v7520_v1  ;;  %v840_v32 = vunpack.c.l.bf16 %v6106_v7  ;;  %v7323_v18 = vld [vmem:[#allocation8 + $0x68] sm:$0xff]  }
  0x3c   : > { %v3213_v33 = vsel %vm3151_vm3, %v3203_v56, %v3212_v9  ;;  %6642 = vmatmul.mubr.msk.bf16.gmra.mrb[12].mxu1 %vm1101_vm2, %v7310_v16  ;;  %v3226_v34 = vrot.slane %v3224_v12, 1  ;;  %v3229_v35 = vrot.slane %v3227_v17, 2  ;;  %v835_v37 = vpack.c.bf16 %v7491_v28, %v833_v31  ;;  %v7322_v12 = vld [vmem:[#allocation8 + $0x18] sm:$0xff]   ;;  %v7324_v16 = vld [vmem:[#allocation8 + $0x20] sm:$0xff]   ;;  %v7334_v31 = vld [vmem:[#allocation8 + $0x8] sm:$0xff]  }
  0x3d   : > { %801 = vst [vmem:[#allocation8 + $0x7c] sm:$0xf] %v799_v27  ;;  %819 = vst [vmem:[#allocation8 + $0x80] sm:$0xf] %v817_v29  ;;  %6645 = vmatprep.mubr.msk.bf16.mxu1 %vm1101_vm2, %v7312_v23  ;;  %v851_v38 = vsel %vm239_vm1, %v840_v32, %v7520_v1  ;;  %v858_v39 = vunpack.c.h.bf16 %v6106_v7  ;;  %v876_v40 = vunpack.c.l.bf16 %v6108_v30  ;;  %v3222_v41 = vsel %vm3151_vm3, %v3212_v9, %v3221_v22  ;;  %v7321_v7 = vld [vmem:[#allocation8 + $0x60] sm:$0xff]   ;;  %v7326_v27 = vld [vmem:[#allocation8 + $0x28] sm:$0xff]  }
  0x3e   : > { %v3235_v42 = vrot.slane %v3233_v25, 1  ;;  %v3238_v43 = vrot.slane %v3236_v26, 2  ;;  %837 = vst [vmem:[#allocation8 + $0x84] sm:$0xf] %v835_v37  ;;  %v853_v14 = vpack.c.bf16 %v7491_v28, %v851_v38  ;;  %v3230_v47 = vor.u32 %v3229_v35, %v3226_v34  ;;  %v7333_v25 = vld [vmem:[#allocation8] sm:$0xff]  }
  0x3f   : > { %v869_v45 = vsel %vm239_vm1, %v858_v39, %v7520_v1  ;;  %v887_v46 = vsel %vm239_vm1, %v876_v40, %v7520_v1  ;;  %v3242_v49 = vshrl.u32 %v7317_v36, 16  ;;  %v3245_v52 = vshll.u32 %v7317_v36, 16  ;;  %v7830_v35 = vld [vmem:[%s8253_s0 + $0xe] sm:$0x3] }
  0x40   : > { %v871_v50 = vpack.c.bf16 %v7491_v28, %v869_v45  ;;  %855 = vst [vmem:[#allocation8 + $0x88] sm:$0xf] %v853_v14  ;;  %v889_v13 = vpack.c.bf16 %v7491_v28, %v887_v46  ;;  %v894_v53 = vunpack.c.h.bf16 %v6108_v30  ;;  %v912_v54 = vunpack.c.l.bf16 %v6110_v44  ;;  %v7332_v14 = vld [vmem:[#allocation8 + $0x40] sm:$0xff]   ;;  %v7338_v46 = vld [vmem:[#allocation8 + $0x18] sm:$0xff]  }
  0x41   : > { %6790 = vmatmul.mubr.msk.bf16.gmra.mrb[8].mxu0 %vm1101_vm2, %v3213_v33  ;;  %v3239_v55 = vor.u32 %v3238_v43, %v3235_v42  ;;  %v3231_v61 = vsel %vm3151_vm3, %v3221_v22, %v3230_v47  ;;  %v3244_v62 = vrot.slane %v3242_v49, 1  ;;  %v3247_v63 = vrot.slane %v3245_v52, 2  ;;  %v7325_v22 = vld [vmem:[#allocation8 + $0x70] sm:$0xff]   ;;  %v7330_v42 = vld [vmem:[#allocation8 + $0x38] sm:$0xff]  }
  0x42   : > { %6793 = vmatprep.mubr.msk.bf16.mxu0 %vm1101_vm2, %v3222_v41  ;;  %873 = vst [vmem:[#allocation8 + $0x8c] sm:$0xf] %v871_v50  ;;  %891 = vst [vmem:[#allocation8 + $0x90] sm:$0xf] %v889_v13  ;;  %v905_v56 = vsel %vm239_vm1, %v894_v53, %v7520_v1  ;;  %v923_v57 = vsel %vm239_vm1, %v912_v54, %v7520_v1  ;;  %v3797_v9 = vrot.slane %v7319_v2, 2  ;;  %v3798_v10 = vrot.slane %v7320_v58, 2 }
  0x43   : > { %v907_v59 = vpack.c.bf16 %v7491_v28, %v905_v56  ;;  %v925_v60 = vpack.c.bf16 %v7491_v28, %v923_v57  ;;  %v3240_v0 = vsel %vm3151_vm3, %v3230_v47, %v3239_v55  ;;  %v7808_v5 = vor.u32 %v3247_v63, %v3244_v62  ;;  %v7328_v33 = vld [vmem:[#allocation8 + $0x30] sm:$0xff]   ;;  %v7335_v56 = vld [vmem:[#allocation8 + $0x48] sm:$0xff]   ;;  %v7340_v58 = vld [vmem:[#allocation8 + $0x20] sm:$0xff]  }
  0x44   : > { %6646 = vmatmul.mubr.msk.bf16.gmra.mrb[16].mxu1 %vm1101_vm2, %v7314_v48  ;;  %v3799_v15 = vsel %vm3796_vm4, %v3797_v9, %v3798_v10  ;;  %v930_v17 = vunpack.c.h.bf16 %v6110_v44  ;;  %v3800_v21 = vrot.slane %v7322_v12, 2  ;;  %v3802_v23 = vrot.slane %v7324_v16, 2  ;;  %v7327_v37 = vld [vmem:[#allocation8 + $0x78] sm:$0xff]   ;;  %v7336_v43 = vld [vmem:[#allocation8 + $0x10] sm:$0xff]   ;;  %v7342_v2 = vld [vmem:[#allocation8 + $0x28] sm:$0xff]  }
  0x45   : > { %6649 = vmatprep.mubr.msk.bf16.mxu1 %vm1101_vm2, %v7316_v51  ;;  %909 = vst [vmem:[#allocation8 + $0x94] sm:$0xf] %v907_v59  ;;  %927 = vst [vmem:[#allocation8 + $0x98] sm:$0xf] %v925_v60  ;;  %v3249_v11 = vsel %vm3151_vm3, %v3239_v55, %v7808_v5  ;;  %v4400_v30 = vsel %vm1156_vm0, %v7721_v24, 0  ;;  %v1509_v34 = vshll.u32 %v7333_v25, 16 }
  0x46   : > { %v941_v19 = vsel %vm239_vm1, %v930_v17, %v7520_v1  ;;  %v3801_v29 = vsel %vm3796_vm4, %v3798_v10, %v3800_v21  ;;  %v3803_v32 = vsel %vm3796_vm4, %v3800_v21, %v3802_v23  ;;  %v3804_v36 = vrot.slane %v7326_v27, 2  ;;  %v7329_v24 = vld [vmem:[#allocation8 + $0x80] sm:$0xff]  }
  0x47   : > { %v943_v26 = vpack.c.bf16 %v7491_v28, %v941_v19  ;;  %v1514_v38 = vshll.u32 %v7334_v31, 16  ;;  %v3806_v39 = vrot.slane %v7328_v33, 2  ;;  %v1507_v40 = vshrl.u32 %v7333_v25, 16  ;;  %v7341_v21 = vld [vmem:[#allocation8 + $0x60] sm:$0xff]   ;;  %v7346_v25 = vld [vmem:[#allocation8 + $0x38] sm:$0xff]  }
  0x48   : > { %v1511_v41 = vrot.slane %v1509_v34, 1  ;;  %v3805_v44 = vsel %vm3796_vm4, %v3802_v23, %v3804_v36  ;;  %v1522_v50 = vshll.u32 %v7336_v43, 16  ;;  %v3808_v51 = vrot.slane %v7330_v42, 2 }
  0x49   : > { %6794 = vmatmul.mubr.msk.bf16.gmra.mrb[12].mxu0 %vm1101_vm2, %v3231_v61  ;;  %945 = vst [vmem:[#allocation8 + $0x9c] sm:$0xf] %v943_v26  ;;  %v1516_v45 = vrot.slane %v1514_v38, 1  ;;  %v3807_v47 = vsel %vm3796_vm4, %v3804_v36, %v3806_v39  ;;  %v7331_v49 = vld [vmem:[#allocation8 + $0x88] sm:$0xff]   ;;  %v1518_v52 = vshrl.u32 %v7334_v31, 16  ;;  %v3810_v13 = vrot.slane %v7332_v14, 2 }
  0x4a   : > { %6797 = vmatprep.mubr.msk.bf16.mxu0 %vm1101_vm2, %v3240_v0  ;;  %v1512_v48 = vor.u32 %v1511_v41, %v1507_v40  ;;  %v1526_v54 = vshrl.u32 %v7336_v43, 16  ;;  %v1530_v55 = vshll.u32 %v7338_v46, 16  ;;  %v1524_v57 = vrot.slane %v1522_v50, 1  ;;  %v7337_v61 = vld [vmem:[#allocation8 + $0x50] sm:$0xff]   ;;  %v7343_v38 = vld [vmem:[#allocation8 + $0x68] sm:$0xff]   ;;  %v7348_v40 = vld [vmem:[#allocation8 + $0x40] sm:$0xff]  }
  0x4b   : > { %v3809_v59 = vsel %vm3796_vm4, %v3806_v39, %v3808_v51  ;;  %v1520_v60 = vor.u32 %v1518_v52, %v1516_v45  ;;  %v3811_v62 = vsel %vm3796_vm4, %v3808_v51, %v3810_v13  ;;  %v1538_v9 = vshll.u32 %v7340_v58, 16  ;;  %v7345_v43 = vld [vmem:[#allocation8 + $0x70] sm:$0xff]   ;;  %v7367_v8 = vld [vmem:[#allocation8 + $0x88] sm:$0xff]  }
  0x4c   : > { %6650 = vmatmul.mubr.msk.bf16.gmra.mrb[20].mxu1 %vm1101_vm2, %v7318_v4  ;;  %v1517_v53 = vsel %vm1505_vm5, %v1512_v48, %v1516_v45  ;;  %v1528_v63 = vor.u32 %v1526_v54, %v1524_v57  ;;  %v1532_v0 = vrot.slane %v1530_v55, 1  ;;  %v2221_v4 = vsel %vm1156_vm0, %v7658_v20, 0  ;;  %v7344_v20 = vld [vmem:[#allocation8 + $0x30] sm:$0xff]   ;;  %v7347_v54 = vld [vmem:[#allocation8 + $0x78] sm:$0xff]  }
  0x4d   : > { %6653 = vmatprep.mubr.msk.bf16.mxu1 %vm1101_vm2, %v7321_v7  ;;  %v3812_v7 = vrot.slane %v7335_v56, 2  ;;  %v1525_v10 = vsel %vm1505_vm5, %v1520_v60, %v1524_v57  ;;  %v1534_v12 = vshrl.u32 %v7338_v46, 16  ;;  %v1542_v16 = vshrl.u32 %v7340_v58, 16  ;;  %v7350_v46 = vld [vmem:[#allocation8 + $0x48] sm:$0xff]   ;;  %v7352_v56 = vld [vmem:[#allocation8 + $0x50] sm:$0xff]  }
  0x4e   : > { %v1546_v17 = vshll.u32 %v7342_v2, 16  ;;  %v1540_v19 = vrot.slane %v1538_v9, 1  ;;  %v3818_v31 = vrot.slane %v7341_v21, 2  ;;  %v1550_v34 = vshrl.u32 %v7342_v2, 16 }
  0x4f   : > { %v1536_v23 = vor.u32 %v1534_v12, %v1532_v0  ;;  %v1558_v36 = vshrl.u32 %v7344_v20, 16  ;;  %v1570_v48 = vshll.u32 %v7348_v40, 16  ;;  %v3822_v50 = vrot.slane %v7345_v43, 2  ;;  %v7357_v43 = vld [vmem:[#allocation8 + $0x10] sm:$0xfc]  }
  0x50   : > { %v1544_v27 = vor.u32 %v1542_v16, %v1540_v19  ;;  %v1566_v51 = vshrl.u32 %v7346_v25, 16  ;;  %v1586_v2 = vshll.u32 %v7352_v56, 16  ;;  %v1590_v12 = vshrl.u32 %v7352_v56, 16  ;;  %v7351_v16 = vld [vmem:[#allocation8 + $0x88] sm:$0xff]  }
  0x51   : > { %6798 = vmatmul.mubr.msk.bf16.gmra.mrb[16].mxu0 %vm1101_vm2, %v3249_v11  ;;  %v3814_v11 = vrot.slane %v7337_v61, 2  ;;  %v1541_v33 = vsel %vm1505_vm5, %v1536_v23, %v1540_v19  ;;  %v1572_v55 = vrot.slane %v1570_v48, 1  ;;  %v7356_v19 = vld [vmem:[#allocation8 + $0x60] sm:$0xff]  }
  0x52   : > { %6819 = vmatprep.mubr.msk.bf16.mxu0 %vm1101_vm2, %v3799_v15  ;;  %v1533_v15 = vsel %vm1505_vm5, %v1528_v63, %v1532_v0  ;;  %v7354_v63 = vld [vmem:[#allocation8 + $0x58] sm:$0xff]   ;;  %v7876_v0 = vld [vmem:[%s8253_s0 + $0x6] sm:$0x3] }
  0x53   : > { %v3815_v26 = vsel %vm3796_vm4, %v3812_v7, %v3814_v11 }
  0x54   : > { %6654 = vmatmul.mubr.msk.bf16.gmra.mrb[24].mxu1 %vm1101_vm2, %v7323_v18  ;;  %v7339_v18 = vld [vmem:[#allocation8 + $0x58] sm:$0xff]  }
  0x55   : > { %6657 = vmatprep.mubr.msk.bf16.mxu1 %vm1101_vm2, %v7325_v22  ;;  %v3813_v22 = vsel %vm3796_vm4, %v3810_v13, %v3812_v7  ;;  %v1574_v13 = vshrl.u32 %v7348_v40, 16  ;;  %v7361_v40 = vld [vmem:[#allocation8 + $0x70] sm:$0xff]  }
  0x56   : > { %v1622_v56 = vshrl.u32 %v7361_v40, 16 }
  0x57   : > { %v1576_v61 = vor.u32 %v1574_v13, %v1572_v55  ;;  %v4308_v13 = vrot.slane %v7357_v43, 2  ;;  %v7370_v43 = vld [vmem:[#allocation8 + $0x48] sm:$0xff]  }
  0x59   : > { %6820 = vmatmul.mubr.msk.bf16.vlgmr.msra.gmra.mrb[0].mxu0 %vm1101_vm2, %v3801_v29  ;;  %v1548_v29 = vrot.slane %v1546_v17, 1  ;;  %v960_v17 = vshrl.u32 %v236_v3, 7  ;;  %v1602_v3 = vshll.u32 %v7356_v19, 16 }
  0x5a   : > { %6856 = vmatpush3.bf16.msra.mxu0 %v4400_v30  ;;  %6823 = vmatprep.mubr.msk.bf16.mxu0 %vm1101_vm2, %v3803_v32  ;;  %v3816_v30 = vrot.slane %v7339_v18, 2  ;;  %v1554_v32 = vshll.u32 %v7344_v20, 16  ;;  %v1588_v18 = vrot.slane %v1586_v2, 1 }
  0x5b   : > { %7267 = vmatprep.subr.msk.bf16.mxu0 %vm1156_vm0, %v7830_v35  ;;  %v1552_v42 = vor.u32 %v1550_v34, %v1548_v29  ;;  %v1598_v34 = vshrl.u32 %v7354_v63, 16 }
  0x5c   : > { %6658 = vmatmul.mubr.msk.bf16.gmra.mrb[28].mxu1 %vm1101_vm2, %v7327_v37  ;;  %v1562_v37 = vshll.u32 %v7346_v25, 16  ;;  %v1556_v39 = vrot.slane %v1554_v32, 1  ;;  %v3817_v41 = vsel %vm3796_vm4, %v3814_v11, %v3816_v30  ;;  %v1592_v25 = vor.u32 %v1590_v12, %v1588_v18 }
  0x5d   : > { %6661 = vmatprep.mubr.msk.bf16.mxu1 %vm1101_vm2, %v7329_v24  ;;  %v1549_v24 = vsel %vm1505_vm5, %v1544_v27, %v1548_v29  ;;  %v7359_v27 = vld [vmem:[#allocation8 + $0x68] sm:$0xff]   ;;  %v961_v29 = vadd.s32 320, %v960_v17 }
  0x5e   : > { %v1560_v14 = vor.u32 %v1558_v36, %v1556_v39  ;;  %v1564_v45 = vrot.slane %v1562_v37, 1  ;;  %v1606_v37 = vshrl.u32 %v7356_v19, 16  ;;  %v1642_v19 = vshll.u32 %v7367_v8, 16 }
  0x5f   : > { %vm962_vm6 = vcmp.lt.s32.totalorder %v961_v29, 324 }
  0x60   : > { %v1565_v52 = vsel %vm1505_vm5, %v1560_v14, %v1564_v45  ;;  %v1568_v58 = vor.u32 %v1566_v51, %v1564_v45  ;;  %v1618_v51 = vshll.u32 %v7361_v40, 16  ;;  %v7368_v40 = vld [vmem:[#allocation8 + $0x40] sm:$0xff]  }
  0x61   : > { %6824 = vmatmul.mubr.msk.bf16.gmra.mrb[4].mxu0 %vm1101_vm2, %v3805_v44  ;;  %v3819_v44 = vsel %vm3796_vm4, %v3816_v30, %v3818_v31  ;;  %v3828_v30 = vrot.slane %v7351_v16, 2 }
  0x62   : > { %6827 = vmatprep.mubr.msk.bf16.mxu0 %vm1101_vm2, %v3807_v47  ;;  %v3820_v47 = vrot.slane %v7343_v38, 2  ;;  %v1573_v7 = vsel %vm1505_vm5, %v1568_v58, %v1572_v55  ;;  %v7358_v38 = vld [vmem:[#allocation8 + $0x18] sm:$0xff]  }
  0x64   : > { %6662 = vmatmul.mubr.msk.bf16.gmra.mrb[32].mxu1 %vm1101_vm2, %v7331_v49  ;;  %v1557_v49 = vsel %vm1505_vm5, %v1552_v42, %v1556_v39  ;;  %v3821_v57 = vsel %vm3796_vm4, %v3818_v31, %v3820_v47  ;;  %v3823_v60 = vsel %vm3796_vm4, %v3820_v47, %v3822_v50  ;;  %v1604_v39 = vrot.slane %v1602_v3, 1  ;;  %v6112_v47 = vld [vmem:[%s7570_s5 + $0xa0] sm:$0xf] }
  0x65   : > { %6667 = vmatprep.mubr.msk.bf16.mxu1 %vm1101_vm2, %v1517_v53  ;;  %v1578_v53 = vshll.u32 %v7350_v46, 16  ;;  %v1644_v3 = vrot.slane %v1642_v19, 1  ;;  %v7381_v19 = vld [vmem:[#allocation8 + $0x70] sm:$0xff]  }
  0x66   : > { %v1608_v14 = vor.u32 %v1606_v37, %v1604_v39  ;;  %v7372_v37 = vld [vmem:[#allocation8 + $0x8] sm:$0xff]  }
  0x69   : > { %6828 = vmatmul.mubr.msk.bf16.gmra.mrb[8].mxu0 %vm1101_vm2, %v3809_v59  ;;  %v7349_v59 = vld [vmem:[#allocation8 + $0x80] sm:$0xff]  }
  0x6a   : > { %6831 = vmatprep.mubr.msk.bf16.mxu0 %vm1101_vm2, %v3811_v62  ;;  %v1580_v62 = vrot.slane %v1578_v53, 1  ;;  %v3826_v9 = vrot.slane %v7349_v59, 2  ;;  %v1614_v53 = vshrl.u32 %v7359_v27, 16 }
  0x6c   : > { %6668 = vmatmul.mubr.msk.bf16.vlgmr.msra.gmra.mrb[0].mxu1 %vm1101_vm2, %v1525_v10  ;;  %v1582_v10 = vshrl.u32 %v7350_v46, 16  ;;  %v1581_v11 = vsel %vm1505_vm5, %v1576_v61, %v1580_v62  ;;  %v7363_v46 = vld [vmem:[#allocation8 + $0x78] sm:$0xff]   ;;  %v7365_v61 = vld [vmem:[#allocation8 + $0x80] sm:$0xff]  }
  0x6d   : > { %6671 = vmatprep.mubr.msk.bf16.mxu1 %vm1101_vm2, %v1533_v15  ;;  %6704 = vmatpush3.bf16.msra.mxu1 %v2221_v4  ;;  %v3824_v4 = vrot.slane %v7347_v54, 2  ;;  %v1594_v15 = vshll.u32 %v7354_v63, 16  ;;  %v7360_v63 = vld [vmem:[#allocation8 + $0x20] sm:$0xff]  }
  0x6e   : > { %7262 = vmatprep.subr.msk.bf16.mxu1 %vm1156_vm0, %v7876_v0  ;;  %v1584_v20 = vor.u32 %v1582_v10, %v1580_v62 }
  0x6f   : > { %v3825_v21 = vsel %vm3796_vm4, %v3822_v50, %v3824_v4  ;;  %v3827_v23 = vsel %vm3796_vm4, %v3824_v4, %v3826_v9  ;;  %v4309_v50 = vrot.slane %v7358_v38, 2  ;;  %v7362_v4 = vld [vmem:[#allocation8 + $0x28] sm:$0xff]   ;;  %v7371_v38 = vld [vmem:[#allocation8] sm:$0xfe]  }
  0x70   : > { %v1589_v31 = vsel %vm1505_vm5, %v1584_v20, %v1588_v18  ;;  %v4313_v16 = vrot.slane %v7362_v4, 2  ;;  %v1638_v18 = vshrl.u32 %v7365_v61, 16 }
  0x71   : > { %6832 = vmatmul.mubr.msk.bf16.gmra.mrb[12].mxu0 %vm1101_vm2, %v3813_v22  ;;  %v7353_v22 = vld [vmem:[#allocation8 + $0x90] sm:$0xff]  }
  0x72   : > { %6835 = vmatprep.mubr.msk.bf16.mxu0 %vm1101_vm2, %v3815_v26  ;;  %v1596_v26 = vrot.slane %v1594_v15, 1  ;;  %v3830_v32 = vrot.slane %v7353_v22, 2  ;;  %v1630_v15 = vshrl.u32 %v7363_v46, 16 }
  0x74   : > { %6672 = vmatmul.mubr.msk.bf16.gmra.mrb[4].mxu1 %vm1101_vm2, %v1541_v33  ;;  %v7355_v33 = vld [vmem:[#allocation8 + $0x98] ss:$0 sps:$4 sm:$0x33]   ;;  %v1597_v36 = vsel %vm1505_vm5, %v1592_v25, %v1596_v26  ;;  %v1600_v42 = vor.u32 %v1598_v34, %v1596_v26  ;;  %v7369_v26 = vld [vmem:[#allocation8 + $0x90] ss:$0 sps:$4 sm:$0x11]  }
  0x75   : > { %6675 = vmatprep.mubr.msk.bf16.mxu1 %vm1101_vm2, %v1549_v24  ;;  %v1610_v24 = vshll.u32 %v7359_v27, 16  ;;  %v3832_v48 = vrot.slane %v7355_v33, 2  ;;  %v7366_v25 = vld [vmem:[#allocation8 + $0x38] sm:$0xff]   ;;  %v5045_v27 = vsel %vm1156_vm0, %v7830_v35, 0  ;;  %v1650_v35 = vshll.u32 %v7369_v26, 16 }
  0x76   : > { %v4317_v34 = vrot.slane %v7366_v25, 2  ;;  %v4331_v25 = vrot.slane %v7381_v19, 2 }
  0x77   : > { %v1612_v45 = vrot.slane %v1610_v24, 1  ;;  %v3833_v62 = vsel %vm3796_vm4, %v3830_v32, %v3832_v48 }
  0x79   : > { %6836 = vmatmul.mubr.msk.bf16.gmra.mrb[16].mxu0 %vm1101_vm2, %v3817_v41  ;;  %v3829_v41 = vsel %vm3796_vm4, %v3826_v9, %v3828_v30  ;;  %v1613_v55 = vsel %vm1505_vm5, %v1608_v14, %v1612_v45  ;;  %v1616_v2 = vor.u32 %v1614_v53, %v1612_v45  ;;  %v2129_v14 = vrot.slane %v7371_v38, 1 }
  0x7a   : > { %6839 = vmatprep.mubr.msk.bf16.mxu0 %vm1101_vm2, %v3819_v44  ;;  %v3831_v44 = vsel %vm3796_vm4, %v3828_v30, %v3830_v32  ;;  %v2130_v45 = vrot.slane %v7372_v37, 1 }
  0x7c   : > { %6676 = vmatmul.mubr.msk.bf16.gmra.mrb[8].mxu1 %vm1101_vm2, %v1557_v49  ;;  %v957_v49 = vunpack.c.l.bf16 %v6112_v47  ;;  %v4319_v47 = vrot.slane %v7368_v40, 2 }
  0x7d   : > { %6679 = vmatprep.mubr.msk.bf16.mxu1 %vm1101_vm2, %v1565_v52  ;;  %v1605_v52 = vsel %vm1505_vm5, %v1600_v42, %v1604_v39  ;;  %v1652_v42 = vrot.slane %v1650_v35, 1  ;;  %v7387_v35 = vld [vmem:[#allocation8 + $0x88] sm:$0xff]  }
  0x7e   : > { %v963_v54 = vsel %vm962_vm6, %v957_v49, %v7520_v1  ;;  %v7376_v49 = vld [vmem:[#allocation8 + $0x18] sm:$0xff]   ;;  %v4337_v40 = vrot.slane %v7387_v35, 2 }
  0x7f   : > { %v968_v58 = vsel %vm239_vm1, %v963_v54, %v7520_v1  ;;  %v7375_v54 = vld [vmem:[#allocation8 + $0x58] sm:$0xff]  }
  0x80   : > { %v970_v59 = vpack.c.bf16 %v7491_v28, %v968_v58  ;;  %v1634_v28 = vshll.u32 %v7365_v61, 16 }
  0x81   : > { %6840 = vmatmul.mubr.msk.bf16.gmra.mrb[20].mxu0 %vm1101_vm2, %v3821_v57  ;;  %v1626_v57 = vshll.u32 %v7363_v46, 16  ;;  %v7374_v46 = vld [vmem:[#allocation8 + $0x10] sm:$0xff]  }
  0x82   : > { %6843 = vmatprep.mubr.msk.bf16.mxu0 %vm1101_vm2, %v3823_v60  ;;  %v1620_v60 = vrot.slane %v1618_v51, 1  ;;  %972 = vst [vmem:[#allocation8 + $0xa0] sm:$0xf] %v970_v59  ;;  %v1636_v20 = vrot.slane %v1634_v28, 1  ;;  %v2131_v51 = vsel %vm2128_vm7, %v2129_v14, %v2130_v45  ;;  %v2132_v53 = vrot.slane %v7374_v46, 1  ;;  %v7378_v59 = vld [vmem:[#allocation8 + $0x20] sm:$0xff]  }
  0x83   : > { %v1628_v10 = vrot.slane %v1626_v57, 1  ;;  %v7466_v28 = vld [vmem:[%s8253_s0 + $0x8] sm:$0x3]  ;;  %v7391_v46 = vld [vmem:[#allocation8 + $0x98] sm:$0xff]  }
  0x84   : > { %6680 = vmatmul.mubr.msk.bf16.gmra.mrb[12].mxu1 %vm1101_vm2, %v1573_v7  ;;  %v4310_v7 = vsel %vm3796_vm4, %v4308_v13, %v4309_v50  ;;  %v1624_v9 = vor.u32 %v1622_v56, %v1620_v60  ;;  %v1621_v12 = vsel %vm1505_vm5, %v1616_v2, %v1620_v60  ;;  %v1640_v30 = vor.u32 %v1638_v18, %v1636_v20  ;;  %v7373_v13 = vld [vmem:[#allocation8 + $0x50] sm:$0xff]   ;;  %v7377_v2 = vld [vmem:[#allocation8 + $0x60] sm:$0xff]  }
  0x85   : > { %6683 = vmatprep.mubr.msk.bf16.mxu1 %vm1101_vm2, %v1581_v11  ;;  %v4311_v11 = vrot.slane %v7360_v63, 2  ;;  %v4323_v57 = vrot.slane %v7373_v13, 2  ;;  %v2133_v58 = vsel %vm2128_vm7, %v2130_v45, %v2132_v53  ;;  %v4325_v60 = vrot.slane %v7375_v54, 2 }
  0x86   : > { %v1629_v17 = vsel %vm1505_vm5, %v1624_v9, %v1628_v10  ;;  %v1645_v24 = vsel %vm1505_vm5, %v1640_v30, %v1644_v3  ;;  %v2732_v63 = vsel %vm1156_vm0, %v7876_v0, 0  ;;  %v7379_v9 = vld [vmem:[#allocation8 + $0x68] sm:$0xff]   ;;  %v4327_v0 = vrot.slane %v7377_v2, 2 }
  0x87   : > { %v4312_v22 = vsel %vm3796_vm4, %v4309_v50, %v4311_v11  ;;  %v4314_v29 = vsel %vm3796_vm4, %v4311_v11, %v4313_v16  ;;  %v4321_v50 = vrot.slane %v7370_v43, 2  ;;  %v7389_v43 = vld [vmem:[#allocation8 + $0x90] sm:$0xff]  }
  0x88   : > { %v4328_v18 = vsel %vm3796_vm4, %v4325_v60, %v4327_v0 }
  0x89   : > { %6844 = vmatmul.mubr.msk.bf16.gmra.mrb[24].mxu0 %vm1101_vm2, %v3825_v21  ;;  %v7364_v21 = vld [vmem:[#allocation8 + $0x30] sm:$0xff]   ;;  %v4322_v56 = vsel %vm3796_vm4, %v4319_v47, %v4321_v50  ;;  %v4324_v4 = vsel %vm3796_vm4, %v4321_v50, %v4323_v57 }
  0x8a   : > { %6847 = vmatprep.mubr.msk.bf16.mxu0 %vm1101_vm2, %v3827_v23  ;;  %v1632_v23 = vor.u32 %v1630_v15, %v1628_v10  ;;  %v4315_v32 = vrot.slane %v7364_v21, 2  ;;  %v4326_v10 = vsel %vm3796_vm4, %v4323_v57, %v4325_v60  ;;  %v7382_v15 = vld [vmem:[#allocation8 + $0x30] sm:$0xff]  }
  0x8b   : > { %v2140_v21 = vrot.slane %v7382_v15, 1  ;;  %v7395_v50 = vld [vmem:[#allocation8 + $0x10] sm:$0xfc]  }
  0x8c   : > { %6684 = vmatmul.mubr.msk.bf16.gmra.mrb[16].mxu1 %vm1101_vm2, %v1589_v31  ;;  %v7925_v31 = vld [vmem:[%s8253_s0 + $0x10] sm:$0x3]  ;;  %v1637_v33 = vsel %vm1505_vm5, %v1632_v23, %v1636_v20  ;;  %v4316_v39 = vsel %vm3796_vm4, %v4313_v16, %v4315_v32  ;;  %v7384_v16 = vld [vmem:[#allocation8 + $0x38] sm:$0xff]   ;;  %v4821_v57 = vshrl.u32 %v7395_v50, 16 }
  0x8d   : > { %6687 = vmatprep.mubr.msk.bf16.mxu1 %vm1101_vm2, %v1597_v36  ;;  %v1646_v36 = vshrl.u32 %v7367_v8, 16  ;;  %v2142_v23 = vrot.slane %v7384_v16, 1 }
  0x8f   : > { %v2143_v30 = vsel %vm2128_vm7, %v2140_v21, %v2142_v23 }
  0x91   : > { %6848 = vmatmul.mubr.msk.bf16.gmra.mrb[28].mxu0 %vm1101_vm2, %v3829_v41  ;;  %v1648_v41 = vor.u32 %v1646_v36, %v1644_v3  ;;  %v7388_v3 = vld [vmem:[#allocation8 + $0x48] sm:$0xff]  }
  0x92   : > { %6851 = vmatprep.mubr.msk.bf16.mxu0 %vm1101_vm2, %v3831_v44  ;;  %v4318_v44 = vsel %vm3796_vm4, %v4315_v32, %v4317_v34  ;;  %v2146_v37 = vrot.slane %v7388_v3, 1 }
  0x93   : > { %v1653_v48 = vsel %vm1505_vm5, %v1648_v41, %v1652_v42  ;;  %v7392_v42 = vld [vmem:[#allocation8 + $0x58] sm:$0xff]  }
  0x94   : > { %6688 = vmatmul.mubr.msk.bf16.gmra.mrb[20].mxu1 %vm1101_vm2, %v1605_v52  ;;  %v4320_v52 = vsel %vm3796_vm4, %v4317_v34, %v4319_v47 }
  0x95   : > { %6691 = vmatprep.mubr.msk.bf16.mxu1 %vm1101_vm2, %v1613_v55  ;;  %v2134_v55 = vrot.slane %v7376_v49, 1  ;;  %v7394_v49 = vld [vmem:[#allocation8 + $0x60] sm:$0xff]  }
  0x96   : > { %v2152_v60 = vrot.slane %v7394_v49, 1 }
  0x97   : > { %v2135_v61 = vsel %vm2128_vm7, %v2132_v53, %v2134_v55  ;;  %v4339_v53 = vrot.slane %v7389_v43, 2 }
  0x99   : > { %6852 = vmatmul.mubr.msk.bf16.gmra.mrb[32].mxu0 %vm1101_vm2, %v3833_v62  ;;  %v7380_v62 = vld [vmem:[#allocation8 + $0x28] sm:$0xff]   ;;  %v4340_v2 = vsel %vm3796_vm4, %v4337_v40, %v4339_v53 }
  0x9a   : > { %6857 = vmatprep.mubr.msk.bf16.mxu0 %vm1101_vm2, %v4310_v7  ;;  %v2136_v7 = vrot.slane %v7378_v59, 1  ;;  %v2138_v8 = vrot.slane %v7380_v62, 1  ;;  %v7398_v59 = vld [vmem:[#allocation8 + $0x20] sm:$0xff]  }
  0x9c   : > { %6692 = vmatmul.mubr.msk.bf16.gmra.mrb[24].mxu1 %vm1101_vm2, %v1621_v12  ;;  %v2137_v11 = vsel %vm2128_vm7, %v2134_v55, %v2136_v7  ;;  %v4329_v12 = vrot.slane %v7379_v9, 2  ;;  %v2141_v26 = vsel %vm2128_vm7, %v2138_v8, %v2140_v21  ;;  %v4341_v55 = vrot.slane %v7391_v46, 2 }
  0x9d   : > { %6695 = vmatprep.mubr.msk.bf16.mxu1 %vm1101_vm2, %v1629_v17  ;;  %v2139_v17 = vsel %vm2128_vm7, %v2136_v7, %v2138_v8  ;;  %v7400_v7 = vld [vmem:[#allocation8 + $0x28] sm:$0xff]  }
  0x9e   : > { %v4330_v20 = vsel %vm3796_vm4, %v4327_v0, %v4329_v12  ;;  %v4332_v32 = vsel %vm3796_vm4, %v4329_v12, %v4331_v25  ;;  %v4342_v9 = vsel %vm3796_vm4, %v4339_v53, %v4341_v55  ;;  %v4841_v0 = vshll.u32 %v7398_v59, 16 }
  0x9f   : > { %v4847_v16 = vshrl.u32 %v7400_v7, 16 }
  0xa1   : > { %6858 = vmatmul.mubr.msk.bf16.vlgmr.msra.gmra.mrb[0].mxu0 %vm1101_vm2, %v4312_v22  ;;  %v7383_v22 = vld [vmem:[#allocation8 + $0x78] sm:$0xff]  }
  0xa2   : > { %6894 = vmatpush3.bf16.msra.mxu0 %v5045_v27  ;;  %6861 = vmatprep.mubr.msk.bf16.mxu0 %vm1101_vm2, %v4314_v29  ;;  %v7386_v27 = vld [vmem:[#allocation8 + $0x40] sm:$0xff]   ;;  %v4333_v29 = vrot.slane %v7383_v22, 2  ;;  %v7402_v22 = vld [vmem:[#allocation8 + $0x30] sm:$0xff]  }
  0xa3   : > { %7268 = vmatprep.subr.msk.bf16.mxu0 %vm1156_vm0, %v7925_v31  ;;  %v2144_v34 = vrot.slane %v7386_v27, 1 }
  0xa4   : > { %6696 = vmatmul.mubr.msk.bf16.gmra.mrb[28].mxu1 %vm1101_vm2, %v1637_v33  ;;  %v7385_v33 = vld [vmem:[#allocation8 + $0x80] sm:$0xff]   ;;  %v4334_v36 = vsel %vm3796_vm4, %v4331_v25, %v4333_v29 }
  0xa5   : > { %6699 = vmatprep.mubr.msk.bf16.mxu1 %vm1101_vm2, %v1645_v24  ;;  %v4335_v24 = vrot.slane %v7385_v33, 2  ;;  %v2145_v38 = vsel %vm2128_vm7, %v2142_v23, %v2144_v34  ;;  %v2147_v41 = vsel %vm2128_vm7, %v2144_v34, %v2146_v37  ;;  %v7404_v33 = vld [vmem:[#allocation8 + $0x38] sm:$0xff]   ;;  %v4856_v34 = vshrl.u32 %v7402_v22, 16 }
  0xa7   : > { %v4336_v14 = vsel %vm3796_vm4, %v4333_v29, %v4335_v24  ;;  %v4338_v47 = vsel %vm3796_vm4, %v4335_v24, %v4337_v40  ;;  %v7403_v24 = vld [vmem:[#allocation8 + $0x80] sm:$0xff]   ;;  %v4858_v43 = vrot.slane %v4856_v34, 2 }
  0xa8   : > { %v2160_v46 = vrot.slane %v7403_v24, 1 }
  0xa9   : > { %6862 = vmatmul.mubr.msk.bf16.gmra.mrb[4].mxu0 %vm1101_vm2, %v4316_v39  ;;  %v7390_v39 = vld [vmem:[#allocation8 + $0x50] sm:$0xff]  }
  0xaa   : > { %6865 = vmatprep.mubr.msk.bf16.mxu0 %vm1101_vm2, %v4318_v44  ;;  %v7396_v44 = vld [vmem:[#allocation8 + $0x18] sm:$0xff]   ;;  %v2148_v45 = vrot.slane %v7390_v39, 1 }
  0xab   : > { %v4832_v13 = vshll.u32 %v7396_v44, 16 }
  0xac   : > { %6700 = vmatmul.mubr.msk.bf16.gmra.mrb[32].mxu1 %vm1101_vm2, %v1653_v48  ;;  %v2150_v48 = vrot.slane %v7392_v42, 1  ;;  %v2149_v54 = vsel %vm2128_vm7, %v2146_v37, %v2148_v45  ;;  %v4868_v42 = vshll.u32 %v7404_v33, 16 }
  0xad   : > { %6705 = vmatprep.mubr.msk.bf16.mxu1 %vm1101_vm2, %v2131_v51  ;;  %v7397_v51 = vld [vmem:[#allocation8 + $0x68] sm:$0xff]   ;;  %v4834_v62 = vrot.slane %v4832_v13, 3 }
  0xae   : > { %v2153_v15 = vsel %vm2128_vm7, %v2150_v48, %v2152_v60 }
  0xb1   : > { %6866 = vmatmul.mubr.msk.bf16.gmra.mrb[8].mxu0 %vm1101_vm2, %v4320_v52  ;;  %v4829_v52 = vshrl.u32 %v7396_v44, 16 }
  0xb2   : > { %6869 = vmatprep.mubr.msk.bf16.mxu0 %vm1101_vm2, %v4322_v56  ;;  %v2151_v56 = vsel %vm2128_vm7, %v2148_v45, %v2150_v48  ;;  %v5557_v45 = vsel %vm1156_vm0, %v7925_v31, 0  ;;  %v7408_v48 = vld [vmem:[#allocation8 + $0x48] sm:$0xff]  }
  0xb4   : > { %6706 = vmatmul.mubr.msk.bf16.vlgmr.msra.gmra.mrb[0].mxu1 %vm1101_vm2, %v2133_v58  ;;  %v4824_v58 = vshll.u32 %v7395_v50, 16 }
  0xb5   : > { %6709 = vmatprep.mubr.msk.bf16.mxu1 %vm1101_vm2, %v2135_v61  ;;  %6742 = vmatpush3.bf16.msra.mxu1 %v2732_v63  ;;  %v4831_v61 = vrot.slane %v4829_v52, 2  ;;  %v2154_v63 = vrot.slane %v7397_v51, 1  ;;  %v4870_v51 = vrot.slane %v4868_v42, 3 }
  0xb6   : > { %7264 = vmatprep.subr.msk.bf16.mxu1 %vm1156_vm0, %v7466_v28  ;;  %v4826_v8 = vrot.slane %v4824_v58, 3  ;;  %v4838_v28 = vshrl.u32 %v7398_v59, 16  ;;  %v4886_v59 = vshll.u32 %v7408_v48, 16 }
  0xb7   : > { %v4835_v21 = vor.u32 %v4834_v62, %v4831_v61  ;;  %v7410_v61 = vld [vmem:[#allocation8 + $0x10] sm:$0xff]  }
  0xb8   : > { %v4840_v23 = vrot.slane %v4838_v28, 2 }
  0xb9   : > { %6870 = vmatmul.mubr.msk.bf16.gmra.mrb[12].mxu0 %vm1101_vm2, %v4324_v4  ;;  %v7393_v4 = vld [vmem:[#allocation8 + $0xa0] ss:$0 sps:$4 sm:$0x33]  }
  0xba   : > { %6873 = vmatprep.mubr.msk.bf16.mxu0 %vm1101_vm2, %v4326_v10  ;;  %v4823_v10 = vrot.slane %v4821_v57, 2  ;;  %v4343_v12 = vrot.slane %v7393_v4, 2 }
  0xbc   : > { %6710 = vmatmul.mubr.msk.bf16.gmra.mrb[4].mxu1 %vm1101_vm2, %v2137_v11  ;;  %v7399_v11 = vld [vmem:[#allocation8 + $0x70] sm:$0xff]   ;;  %v4827_v19 = vor.u32 %v4826_v8, %v4823_v10  ;;  %v4344_v25 = vsel %vm3796_vm4, %v4341_v55, %v4343_v12  ;;  %v4888_v8 = vrot.slane %v4886_v59, 3 }
  0xbd   : > { %6713 = vmatprep.mubr.msk.bf16.mxu1 %vm1101_vm2, %v2139_v17  ;;  %v4850_v17 = vshll.u32 %v7400_v7, 16  ;;  %v2156_v27 = vrot.slane %v7399_v11, 1  ;;  %v7407_v55 = vld [vmem:[#allocation8 + $0x90] ss:$0 sps:$4 sm:$0x11]   ;;  %v7413_v11 = vld [vmem:[#allocation8 + $0x58] sm:$0xff]  }
  0xbe   : > { %v4836_v29 = vsel %vm4819_vm8, %v4827_v19, %v4835_v21  ;;  %v2164_v4 = vrot.slane %v7407_v55, 1 }
  0xbf   : > { %v4852_v3 = vrot.slane %v4850_v17, 3  ;;  %v2157_v37 = vsel %vm2128_vm7, %v2154_v63, %v2156_v27 }
  0xc1   : > { %6874 = vmatmul.mubr.msk.bf16.gmra.mrb[16].mxu0 %vm1101_vm2, %v4328_v18  ;;  %v7401_v18 = vld [vmem:[#allocation8 + $0x78] sm:$0xff]  }
  0xc2   : > { %6877 = vmatprep.mubr.msk.bf16.mxu0 %vm1101_vm2, %v4330_v20  ;;  %v2155_v20 = vsel %vm2128_vm7, %v2152_v60, %v2154_v63  ;;  %v7409_v60 = vld [vmem:[#allocation8 + $0x8] sm:$0xfe]  }
  0xc3   : > { %v2640_v28 = vrot.slane %v7409_v60, 1  ;;  %v7422_v60 = vld [vmem:[#allocation8 + $0x40] sm:$0xff]  }
  0xc4   : > { %6714 = vmatmul.mubr.msk.bf16.gmra.mrb[8].mxu1 %vm1101_vm2, %v2141_v26  ;;  %v4843_v26 = vrot.slane %v4841_v0, 3  ;;  %v2641_v0 = vrot.slane %v7410_v61, 1 }
  0xc5   : > { %6717 = vmatprep.mubr.msk.bf16.mxu1 %vm1101_vm2, %v2143_v30  ;;  %v4849_v30 = vrot.slane %v4847_v16, 2 }
  0xc6   : > { %v4844_v35 = vor.u32 %v4843_v26, %v4840_v23  ;;  %v7414_v23 = vld [vmem:[#allocation8 + $0x20] sm:$0xff]  }
  0xc7   : > { %v4853_v39 = vor.u32 %v4852_v3, %v4849_v30  ;;  %v7415_v30 = vld [vmem:[#allocation8 + $0x60] sm:$0xff]   ;;  %v2645_v34 = vrot.slane %v7414_v23, 1 }
  0xc8   : > { %v4910_v24 = vshrl.u32 %v7415_v30, 16 }
  0xc9   : > { %6878 = vmatmul.mubr.msk.bf16.gmra.mrb[20].mxu0 %vm1101_vm2, %v4332_v32  ;;  %v2158_v32 = vrot.slane %v7401_v18, 1  ;;  %v4854_v49 = vsel %vm4819_vm8, %v4844_v35, %v4853_v39  ;;  %v7412_v18 = vld [vmem:[#allocation8 + $0x18] sm:$0xff]  }
  0xca   : > { %6881 = vmatprep.mubr.msk.bf16.mxu0 %vm1101_vm2, %v4334_v36  ;;  %v4859_v36 = vshll.u32 %v7402_v22, 16  ;;  %v4904_v22 = vshll.u32 %v7413_v11, 16 }
  0xcb   : > { %v2159_v40 = vsel %vm2128_vm7, %v2156_v27, %v2158_v32  ;;  %v2161_v53 = vsel %vm2128_vm7, %v2158_v32, %v2160_v46 }
  0xcc   : > { %6718 = vmatmul.mubr.msk.bf16.gmra.mrb[12].mxu1 %vm1101_vm2, %v2145_v38  ;;  %v7405_v38 = vld [vmem:[#allocation8 + $0x88] sm:$0xff]   ;;  %v4861_v44 = vrot.slane %v4859_v36, 3 }
  0xcd   : > { %6721 = vmatprep.mubr.msk.bf16.mxu1 %vm1101_vm2, %v2147_v41  ;;  %v4865_v41 = vshrl.u32 %v7404_v33, 16  ;;  %v2162_v52 = vrot.slane %v7405_v38, 1  ;;  %v4906_v33 = vrot.slane %v4904_v22, 3  ;;  %v7417_v36 = vld [vmem:[#allocation8 + $0x68] sm:$0xff]   ;;  %v4913_v38 = vshll.u32 %v7415_v30, 16 }
  0xce   : > { %v4862_v13 = vor.u32 %v4861_v44, %v4858_v43  ;;  %v4919_v42 = vshrl.u32 %v7417_v36, 16  ;;  %v4922_v43 = vshll.u32 %v7417_v36, 16  ;;  %v7418_v44 = vld [vmem:[#allocation8 + $0x30] sm:$0xff]  }
  0xcf   : > { %v4867_v50 = vrot.slane %v4865_v41, 2  ;;  %v2163_v58 = vsel %vm2128_vm7, %v2160_v46, %v2162_v52  ;;  %v4915_v46 = vrot.slane %v4913_v38, 3 }
  0xd0   : > { %v4863_v62 = vsel %vm4819_vm8, %v4853_v39, %v4862_v13  ;;  %v7416_v39 = vld [vmem:[#allocation8 + $0x28] sm:$0xff]  }
  0xd1   : > { %6882 = vmatmul.mubr.msk.bf16.gmra.mrb[24].mxu0 %vm1101_vm2, %v4336_v14  ;;  %v4845_v14 = vsel %vm4819_vm8, %v4835_v21, %v4844_v35  ;;  %v4871_v57 = vor.u32 %v4870_v51, %v4867_v50  ;;  %v2642_v21 = vsel %vm2128_vm7, %v2640_v28, %v2641_v0  ;;  %v4921_v50 = vrot.slane %v4919_v42, 2  ;;  %v7425_v28 = vld [vmem:[#allocation8 + $0x88] sm:$0xff]   ;;  %v7430_v42 = vld [vmem:[#allocation8 + $0x60] sm:$0xff]  }
  0xd2   : > { %6885 = vmatprep.mubr.msk.bf16.mxu0 %vm1101_vm2, %v4338_v47  ;;  %v7406_v47 = vld [vmem:[#allocation8 + $0x40] sm:$0xff]   ;;  %v4924_v51 = vrot.slane %v4922_v43, 3 }
  0xd3   : > { %v4877_v31 = vshll.u32 %v7406_v47, 16  ;;  %v4872_v10 = vsel %vm4819_vm8, %v4862_v13, %v4871_v57  ;;  %v7421_v13 = vld [vmem:[#allocation8 + $0x78] sm:$0xff]  }
  0xd4   : > { %6722 = vmatmul.mubr.msk.bf16.gmra.mrb[16].mxu1 %vm1101_vm2, %v2149_v54  ;;  %v4874_v54 = vshrl.u32 %v7406_v47, 16  ;;  %v2647_v47 = vrot.slane %v7416_v39, 1  ;;  %v4940_v59 = vshll.u32 %v7421_v13, 16 }
  0xd5   : > { %6725 = vmatprep.mubr.msk.bf16.mxu1 %vm1101_vm2, %v2151_v56  ;;  %v4883_v56 = vshrl.u32 %v7408_v48, 16  ;;  %v7419_v48 = vld [vmem:[#allocation8 + $0x70] sm:$0xff]  }
  0xd6   : > { %v4876_v63 = vrot.slane %v4874_v54, 2  ;;  %v2648_v54 = vsel %vm2128_vm7, %v2645_v34, %v2647_v47  ;;  %v4931_v55 = vshll.u32 %v7419_v48, 16 }
  0xd7   : > { %v4885_v7 = vrot.slane %v4883_v56, 2  ;;  %v7420_v56 = vld [vmem:[#allocation8 + $0x38] sm:$0xff]  }
  0xd9   : > { %6886 = vmatmul.mubr.msk.bf16.gmra.mrb[28].mxu0 %vm1101_vm2, %v4340_v2  ;;  %v4879_v2 = vrot.slane %v4877_v31, 3  ;;  %v4889_v19 = vor.u32 %v4888_v8, %v4885_v7  ;;  %v4928_v31 = vshrl.u32 %v7419_v48, 16  ;;  %v2653_v8 = vrot.slane %v7422_v60, 1 }
  0xda   : > { %6889 = vmatprep.mubr.msk.bf16.mxu0 %vm1101_vm2, %v4342_v9  ;;  %v7411_v9 = vld [vmem:[#allocation8 + $0x50] sm:$0xff]  }
  0xdb   : > { %v4880_v12 = vor.u32 %v4879_v2, %v4876_v63  ;;  %v4892_v16 = vshrl.u32 %v7411_v9, 16  ;;  %v4895_v17 = vshll.u32 %v7411_v9, 16  ;;  %v4933_v63 = vrot.slane %v4931_v55, 3 }
  0xdc   : > { %6726 = vmatmul.mubr.msk.bf16.gmra.mrb[20].mxu1 %vm1101_vm2, %v2153_v15  ;;  %v2165_v15 = vsel %vm2128_vm7, %v2162_v52, %v2164_v4  ;;  %v2649_v52 = vrot.slane %v7418_v44, 1  ;;  %v2651_v2 = vrot.slane %v7420_v56, 1  ;;  %v7423_v4 = vld [vmem:[#allocation8 + $0x80] sm:$0xff]   ;;  %v7435_v56 = vld [vmem:[#allocation8 + $0x70] sm:$0xff]  }
  0xdd   : > { %6729 = vmatprep.mubr.msk.bf16.mxu1 %vm1101_vm2, %v2155_v20  ;;  %v4901_v20 = vshrl.u32 %v7413_v11, 16  ;;  %v4894_v26 = vrot.slane %v4892_v16, 2  ;;  %v4897_v27 = vrot.slane %v4895_v17, 3  ;;  %v4890_v3 = vsel %vm4819_vm8, %v4880_v12, %v4889_v19  ;;  %v7424_v16 = vld [vmem:[#allocation8 + $0x48] sm:$0xff]  }
  0xde   : > { %v2652_v11 = vsel %vm2128_vm7, %v2649_v52, %v2651_v2 }
  0xdf   : > { %v4903_v32 = vrot.slane %v4901_v20, 2  ;;  %v4898_v35 = vor.u32 %v4897_v27, %v4894_v26  ;;  %v7426_v20 = vld [vmem:[#allocation8 + $0x50] sm:$0xff]   ;;  %v2655_v26 = vrot.slane %v7424_v16, 1  ;;  %v7438_v16 = vld [vmem:[#allocation8 + $0x28] sm:$0xff]  }
  0xe0   : > { %v7427_v27 = vld [vmem:[#allocation8 + $0x90] sm:$0xff]  }
  0xe1   : > { %6890 = vmatmul.mubr.msk.bf16.gmra.mrb[32].mxu0 %vm1101_vm2, %v4344_v25  ;;  %v4881_v25 = vsel %vm4819_vm8, %v4871_v57, %v4880_v12  ;;  %v4925_v57 = vor.u32 %v4924_v51, %v4921_v50  ;;  %v4946_v12 = vshrl.u32 %v7423_v4, 16  ;;  %v2656_v36 = vsel %vm2128_vm7, %v2653_v8, %v2655_v26 }
  0xe2   : > { %6895 = vmatprep.mubr.msk.bf16.mxu0 %vm1101_vm2, %v4836_v29  ;;  %v2643_v29 = vrot.slane %v7412_v18, 1  ;;  %v2654_v18 = vsel %vm2128_vm7, %v2651_v2, %v2653_v8  ;;  %v2661_v50 = vrot.slane %v7430_v42, 1  ;;  %v7451_v42 = vld [vmem:[#allocation8 + $0x70] sm:$0xff]  }
  0xe3   : > { %v4948_v23 = vrot.slane %v4946_v12, 2 }
  0xe4   : > { %6730 = vmatmul.mubr.msk.bf16.gmra.mrb[24].mxu1 %vm1101_vm2, %v2157_v37  ;;  %v2644_v37 = vsel %vm2128_vm7, %v2641_v0, %v2643_v29  ;;  %v2646_v41 = vsel %vm2128_vm7, %v2643_v29, %v2645_v34 }
  0xe5   : > { %6733 = vmatprep.mubr.msk.bf16.mxu1 %vm1101_vm2, %v2159_v40  ;;  %v4907_v40 = vor.u32 %v4906_v33, %v4903_v32  ;;  %v2657_v32 = vrot.slane %v7426_v20, 1  ;;  %v7429_v33 = vld [vmem:[#allocation8 + $0x98] sm:$0xff]   ;;  %v5470_v20 = vrot.slane %v7438_v16, 3 }
  0xe7   : > { %v2658_v39 = vsel %vm2128_vm7, %v2655_v26, %v2657_v32 }
  0xe9   : > { %6896 = vmatmul.mubr.msk.bf16.vlgmr.msra.gmra.mrb[0].mxu0 %vm1101_vm2, %v4845_v14  ;;  %v4899_v14 = vsel %vm4819_vm8, %v4889_v19, %v4898_v35  ;;  %v4955_v19 = vshrl.u32 %v7425_v28, 16 }
  0xea   : > { %6932 = vmatpush3.bf16.msra.mxu0 %v5557_v45  ;;  %6899 = vmatprep.mubr.msk.bf16.mxu0 %vm1101_vm2, %v4854_v49  ;;  %v4912_v45 = vrot.slane %v4910_v24, 2  ;;  %v4908_v49 = vsel %vm4819_vm8, %v4898_v35, %v4907_v40  ;;  %v4964_v35 = vshrl.u32 %v7427_v27, 16  ;;  %v7428_v24 = vld [vmem:[#allocation8 + $0x58] sm:$0xff]  }
  0xeb   : > { %v4957_v30 = vrot.slane %v4955_v19, 2 }
  0xec   : > { %6734 = vmatmul.mubr.msk.bf16.gmra.mrb[28].mxu1 %vm1101_vm2, %v2161_v53  ;;  %v4916_v53 = vor.u32 %v4915_v46, %v4912_v45  ;;  %v4966_v44 = vrot.slane %v4964_v35, 2  ;;  %v2659_v45 = vrot.slane %v7428_v24, 1  ;;  %v7431_v46 = vld [vmem:[#allocation8 + $0xa0] ss:$0 sps:$4 sm:$0x77]   ;;  %v7449_v24 = vld [vmem:[#allocation8 + $0x68] sm:$0xff]  }
  0xed   : > { %6737 = vmatprep.mubr.msk.bf16.mxu1 %vm1101_vm2, %v2163_v58  ;;  %v4937_v58 = vshrl.u32 %v7421_v13, 16  ;;  %v4982_v13 = vshrl.u32 %v7431_v46, 16 }
  0xee   : > { %v4917_v61 = vsel %vm4819_vm8, %v4907_v40, %v4916_v53  ;;  %v4926_v7 = vsel %vm4819_vm8, %v4916_v53, %v4925_v57  ;;  %v4973_v40 = vshrl.u32 %v7429_v33, 16  ;;  %v4985_v53 = vshll.u32 %v7431_v46, 16 }
  0xef   : > { %v4939_v9 = vrot.slane %v4937_v58, 2  ;;  %v2662_v55 = vsel %vm2128_vm7, %v2659_v45, %v2661_v50  ;;  %v3263_v46 = vshll.u32 %v7449_v24, 16 }
  0xf0   : > { %v4975_v48 = vrot.slane %v4973_v40, 2  ;;  %v4987_v58 = vrot.slane %v4985_v53, 3 }
  0xf1   : > { %6900 = vmatmul.mubr.msk.bf16.gmra.mrb[4].mxu0 %vm1101_vm2, %v4863_v62  ;;  %v4930_v62 = vrot.slane %v4928_v31, 2 }
  0xf2   : > { %6903 = vmatprep.mubr.msk.bf16.mxu0 %vm1101_vm2, %v4872_v10  ;;  %v4942_v10 = vrot.slane %v4940_v59, 3 }
  0xf3   : > { %v4934_v0 = vor.u32 %v4933_v63, %v4930_v62  ;;  %v7434_v62 = vld [vmem:[#allocation8 + $0x18] sm:$0xff]   ;;  %v2665_v63 = vrot.slane %v7435_v56, 1 }
  0xf4   : > { %6738 = vmatmul.mubr.msk.bf16.gmra.mrb[32].mxu1 %vm1101_vm2, %v2165_v15  ;;  %v4949_v15 = vshll.u32 %v7423_v4, 16  ;;  %v4943_v17 = vor.u32 %v4942_v10, %v4939_v9  ;;  %v5466_v10 = vrot.slane %v7434_v62, 3 }
  0xf5   : > { %6743 = vmatprep.mubr.msk.bf16.mxu1 %vm1101_vm2, %v2642_v21  ;;  %v4958_v21 = vshll.u32 %v7425_v28, 16  ;;  %v4935_v22 = vsel %vm4819_vm8, %v4925_v57, %v4934_v0  ;;  %v7439_v28 = vld [vmem:[#allocation8 + $0x80] sm:$0xff]  }
  0xf6   : > { %v4944_v29 = vsel %vm4819_vm8, %v4934_v0, %v4943_v17 }
  0xf9   : > { %6904 = vmatmul.mubr.msk.bf16.gmra.mrb[8].mxu0 %vm1101_vm2, %v4881_v25  ;;  %v4951_v25 = vrot.slane %v4949_v15, 3 }
  0xfa   : > { %6907 = vmatprep.mubr.msk.bf16.mxu0 %vm1101_vm2, %v4890_v3  ;;  %v4960_v3 = vrot.slane %v4958_v21, 3  ;;  %v7441_v21 = vld [vmem:[#allocation8 + $0x88] sm:$0xff]  }
  0xfb   : > { %v4952_v34 = vor.u32 %v4951_v25, %v4948_v23  ;;  %v7443_v23 = vld [vmem:[#allocation8 + $0x90] sm:$0xff]   ;;  %v7447_v25 = vld [vmem:[#allocation8 + $0x60] sm:$0xff]  }
  0xfc   : > { %6744 = vmatmul.mubr.msk.bf16.vlgmr.msra.gmra.mrb[0].mxu1 %vm1101_vm2, %v2644_v37  ;;  %v4967_v37 = vshll.u32 %v7427_v27, 16  ;;  %v4961_v38 = vor.u32 %v4960_v3, %v4957_v30  ;;  %v7440_v27 = vld [vmem:[#allocation8 + $0x30] sm:$0xff]   ;;  %v7442_v3 = vld [vmem:[#allocation8 + $0x38] sm:$0xff]  }
  0xfd   : > { %6747 = vmatprep.mubr.msk.bf16.mxu1 %vm1101_vm2, %v2646_v41  ;;  %6970 = vmatpush3.bf16.msra.mxu1 %v7552_v6  ;;  %v2650_v6 = vsel %vm2128_vm7, %v2647_v47, %v2649_v52  ;;  %v4976_v41 = vshll.u32 %v7429_v33, 16  ;;  %v4953_v43 = vsel %vm4819_vm8, %v4943_v17, %v4952_v34  ;;  %v2660_v52 = vsel %vm2128_vm7, %v2657_v32, %v2659_v45 }
  0xfe   : > { %v4962_v47 = vsel %vm4819_vm8, %v4952_v34, %v4961_v38  ;;  %v2669_v17 = vrot.slane %v7439_v28, 1  ;;  %v2673_v32 = vrot.slane %v7443_v23, 1  ;;  %v3251_v33 = vshrl.u32 %v7447_v25, 16 }
  0xff   : > { %v3254_v34 = vshll.u32 %v7447_v25, 16  ;;  %v3260_v45 = vshrl.u32 %v7449_v24, 16 }
 0x100   : > { %v3253_v40 = vrot.slane %v3251_v33, 1 }
 0x101   : > { %6908 = vmatmul.mubr.msk.bf16.gmra.mrb[12].mxu0 %vm1101_vm2, %v4899_v14  ;;  %v4969_v14 = vrot.slane %v4967_v37, 3  ;;  %v7445_v37 = vld [vmem:[#allocation8 + $0x98] ss:$0 sps:$4 sm:$0x11]   ;;  %v3262_v53 = vrot.slane %v3260_v45, 1 }
 0x102   : > { %6911 = vmatprep.mubr.msk.bf16.mxu0 %vm1101_vm2, %v4908_v49  ;;  %v4978_v49 = vrot.slane %v4976_v41, 3  ;;  %v3256_v41 = vrot.slane %v3254_v34, 2 }
 0x103   : > { %v4970_v51 = vor.u32 %v4969_v14, %v4966_v44  ;;  %v7444_v44 = vld [vmem:[#allocation8 + $0x40] sm:$0xff]   ;;  %v2675_v14 = vrot.slane %v7445_v37, 1 }
 0x104   : > { %6748 = vmatmul.mubr.msk.bf16.gmra.mrb[4].mxu1 %vm1101_vm2, %v2648_v54  ;;  %v7432_v54 = vld [vmem:[#allocation8 + $0x68] sm:$0xff]   ;;  %v4979_v31 = vor.u32 %v4978_v49, %v4975_v48  ;;  %v3257_v49 = vor.u32 %v3256_v41, %v3253_v40  ;;  %v7456_v40 = vld [vmem:[#allocation8 + $0x70] sm:$0xff]  }
 0x105   : > { %6751 = vmatprep.mubr.msk.bf16.mxu1 %vm1101_vm2, %v2650_v6  ;;  %v4971_v57 = vsel %vm4819_vm8, %v4961_v38, %v4970_v51  ;;  %v4984_v6 = vrot.slane %v4982_v13, 2  ;;  %v2663_v59 = vrot.slane %v7432_v54, 1  ;;  %v5474_v38 = vrot.slane %v7442_v3, 3  ;;  %v7446_v48 = vld [vmem:[#allocation8 + $0x48] sm:$0xff]  }
 0x106   : > { %v4980_v60 = vsel %vm4819_vm8, %v4970_v51, %v4979_v31  ;;  %v3272_v51 = vshll.u32 %v7451_v42, 16  ;;  %v2676_v13 = vsel %vm2128_vm7, %v2673_v32, %v2675_v14  ;;  %v3265_v54 = vrot.slane %v3263_v46, 2  ;;  %v7458_v14 = vld [vmem:[#allocation8 + $0x78] sm:$0xff]  }
 0x107   : > { %v4988_v2 = vor.u32 %v4987_v58, %v4984_v6  ;;  %v2664_v4 = vsel %vm2128_vm7, %v2661_v50, %v2663_v59  ;;  %v2666_v8 = vsel %vm2128_vm7, %v2663_v59, %v2665_v63  ;;  %v3269_v50 = vshrl.u32 %v7451_v42, 16  ;;  %v7455_v58 = vld [vmem:[#allocation8 + $0x80] sm:$0xff]  }
 0x108   : > { %v3258_v56 = vsel %vm3151_vm3, %v7808_v5, %v3257_v49  ;;  %v3274_v6 = vrot.slane %v3272_v51, 2  ;;  %v5488_v46 = vrot.slane %v7456_v40, 3 }
 0x109   : > { %6912 = vmatmul.mubr.msk.bf16.gmra.mrb[16].mxu0 %vm1101_vm2, %v4917_v61  ;;  %v7433_v61 = vld [vmem:[#allocation8 + $0x10] sm:$0xf8]   ;;  %v4989_v0 = vsel %vm4819_vm8, %v4979_v31, %v4988_v2  ;;  %v7453_v31 = vld [vmem:[#allocation8 + $0x78] sm:$0xff]  }
 0x10a   : > { %6915 = vmatprep.mubr.msk.bf16.mxu0 %vm1101_vm2, %v4926_v7  ;;  %v7437_v7 = vld [vmem:[#allocation8 + $0x78] sm:$0xff]   ;;  %v5465_v9 = vrot.slane %v7433_v61, 3  ;;  %v3266_v61 = vor.u32 %v3265_v54, %v3262_v53  ;;  %v3278_v62 = vshrl.u32 %v7453_v31, 16 }
 0x10b   : > { %v2667_v12 = vrot.slane %v7437_v7, 1 }
 0x10c   : > { %6752 = vmatmul.mubr.msk.bf16.gmra.mrb[8].mxu1 %vm1101_vm2, %v2652_v11  ;;  %v7436_v11 = vld [vmem:[#allocation8 + $0x20] sm:$0xff]   ;;  %v5467_v15 = vsel %vm5464_vm9, %v5465_v9, %v5466_v10  ;;  %v3287_v9 = vshrl.u32 %v7455_v58, 16  ;;  %v3280_v28 = vrot.slane %v3278_v62, 1 }
 0x10d   : > { %6755 = vmatprep.mubr.msk.bf16.mxu1 %vm1101_vm2, %v2654_v18  ;;  %v5468_v18 = vrot.slane %v7436_v11, 3  ;;  %v2668_v19 = vsel %vm2128_vm7, %v2665_v63, %v2667_v12  ;;  %v3281_v63 = vshll.u32 %v7453_v31, 16  ;;  %v7457_v11 = vld [vmem:[#allocation8 + $0x88] sm:$0xff]  }
 0x10e   : > { %v3289_v16 = vrot.slane %v3287_v9, 1  ;;  %v3299_v23 = vshll.u32 %v7457_v11, 16  ;;  %v7462_v31 = vld [vmem:[#allocation8 + $0x88] sm:$0xff]  }
 0x10f   : > { %v5469_v26 = vsel %vm5464_vm9, %v5466_v10, %v5468_v18  ;;  %v5471_v30 = vsel %vm5464_vm9, %v5468_v18, %v5470_v20  ;;  %v3290_v10 = vshll.u32 %v7455_v58, 16  ;;  %v7459_v18 = vld [vmem:[#allocation8 + $0x90] sm:$0xff]  }
 0x110   : > { %v3301_v34 = vrot.slane %v3299_v23, 2  ;;  %v7463_v58 = vld [vmem:[#allocation8 + $0x90] sm:$0xff]  }
 0x111   : > { %6916 = vmatmul.mubr.msk.bf16.gmra.mrb[20].mxu0 %vm1101_vm2, %v4935_v22  ;;  %v2670_v22 = vsel %vm2128_vm7, %v2667_v12, %v2669_v17 }
 0x112   : > { %6919 = vmatprep.mubr.msk.bf16.mxu0 %vm1101_vm2, %v4944_v29  ;;  %v2671_v29 = vrot.slane %v7441_v21, 1  ;;  %v7452_v21 = vld [vmem:[#allocation8 + $0x60] sm:$0xff]  }
 0x113   : > { %v5484_v3 = vrot.slane %v7452_v21, 3 }
 0x114   : > { %6756 = vmatmul.mubr.msk.bf16.gmra.mrb[12].mxu1 %vm1101_vm2, %v2656_v36  ;;  %v5472_v36 = vrot.slane %v7440_v27, 3  ;;  %v2672_v35 = vsel %vm2128_vm7, %v2669_v17, %v2671_v29  ;;  %v3292_v17 = vrot.slane %v3290_v10, 2 }
 0x115   : > { %6759 = vmatprep.mubr.msk.bf16.mxu1 %vm1101_vm2, %v2658_v39  ;;  %v2674_v39 = vsel %vm2128_vm7, %v2671_v29, %v2673_v32  ;;  %v3305_v29 = vshrl.u32 %v7459_v18, 16 }
 0x116   : > { %v3293_v27 = vor.u32 %v3292_v17, %v3289_v16 }
 0x117   : > { %v3307_v24 = vrot.slane %v3305_v29, 1 }
 0x119   : > { %6920 = vmatmul.mubr.msk.bf16.gmra.mrb[24].mxu0 %vm1101_vm2, %v4953_v43  ;;  %v5473_v43 = vsel %vm5464_vm9, %v5470_v20, %v5472_v36 }
 0x11a   : > { %6923 = vmatprep.mubr.msk.bf16.mxu0 %vm1101_vm2, %v4962_v47  ;;  %v5475_v47 = vsel %vm5464_vm9, %v5472_v36, %v5474_v38  ;;  %v7461_v36 = vld [vmem:[#allocation8 + $0x98] ss:$0 sps:$4 sm:$0x33]  }
 0x11b   : > { %v3314_v42 = vshrl.u32 %v7461_v36, 16 }
 0x11c   : > { %6760 = vmatmul.mubr.msk.bf16.gmra.mrb[16].mxu1 %vm1101_vm2, %v2660_v52  ;;  %v5476_v52 = vrot.slane %v7444_v44, 3 }
 0x11d   : > { %6763 = vmatprep.mubr.msk.bf16.mxu1 %vm1101_vm2, %v2662_v55  ;;  %v5478_v55 = vrot.slane %v7446_v48, 3  ;;  %v3316_v48 = vrot.slane %v3314_v42, 1 }
 0x11e   : > { %v5477_v59 = vsel %vm5464_vm9, %v5474_v38, %v5476_v52 }
 0x11f   : > { %v5479_v2 = vsel %vm5464_vm9, %v5476_v52, %v5478_v55 }
 0x121   : > { %6924 = vmatmul.mubr.msk.bf16.gmra.mrb[28].mxu0 %vm1101_vm2, %v4971_v57  ;;  %v3271_v57 = vrot.slane %v3269_v50, 1  ;;  %v5490_v50 = vrot.slane %v7458_v14, 3 }
 0x122   : > { %6927 = vmatprep.mubr.msk.bf16.mxu0 %vm1101_vm2, %v4980_v60  ;;  %v7448_v60 = vld [vmem:[#allocation8 + $0x50] sm:$0xff]  }
 0x123   : > { %v3275_v7 = vor.u32 %v3274_v6, %v3271_v57  ;;  %v5480_v5 = vrot.slane %v7448_v60, 3  ;;  %v5491_v54 = vsel %vm5464_vm9, %v5488_v46, %v5490_v50  ;;  %v5494_v57 = vrot.slane %v7462_v31, 3  ;;  %v7464_v60 = vld [vmem:[#allocation8 + $0x98] sm:$0xff]  }
 0x124   : > { %6764 = vmatmul.mubr.msk.bf16.gmra.mrb[20].mxu1 %vm1101_vm2, %v2664_v4  ;;  %v7450_v4 = vld [vmem:[#allocation8 + $0x58] sm:$0xff]   ;;  %v5498_v62 = vrot.slane %v7464_v60, 3 }
 0x125   : > { %6767 = vmatprep.mubr.msk.bf16.mxu1 %vm1101_vm2, %v2666_v8  ;;  %v3267_v8 = vsel %vm3151_vm3, %v3257_v49, %v3266_v61  ;;  %v5482_v12 = vrot.slane %v7450_v4, 3 }
 0x127   : > { %v5483_v25 = vsel %vm5464_vm9, %v5480_v5, %v5482_v12 }
 0x129   : > { %6928 = vmatmul.mubr.msk.bf16.gmra.mrb[32].mxu0 %vm1101_vm2, %v4989_v0  ;;  %v3283_v0 = vrot.slane %v3281_v63, 2 }
 0x12a   : > { %6933 = vmatprep.mubr.msk.bf16.mxu0 %vm1101_vm2, %v5467_v15  ;;  %v3276_v15 = vsel %vm3151_vm3, %v3266_v61, %v3275_v7  ;;  %v5496_v61 = vrot.slane %v7463_v58, 3 }
 0x12b   : > { %v3284_v20 = vor.u32 %v3283_v0, %v3280_v28 }
 0x12c   : > { %6768 = vmatmul.mubr.msk.bf16.gmra.mrb[24].mxu1 %vm1101_vm2, %v2668_v19  ;;  %v5481_v19 = vsel %vm5464_vm9, %v5478_v55, %v5480_v5  ;;  %v5497_v63 = vsel %vm5464_vm9, %v5494_v57, %v5496_v61  ;;  %v5499_v4 = vsel %vm5464_vm9, %v5496_v61, %v5498_v62 }
 0x12d   : > { %6771 = vmatprep.mubr.msk.bf16.mxu1 %vm1101_vm2, %v2670_v22  ;;  %v3296_v22 = vshrl.u32 %v7457_v11, 16  ;;  %v3285_v32 = vsel %vm3151_vm3, %v3275_v7, %v3284_v20  ;;  %v3294_v37 = vsel %vm3151_vm3, %v3284_v20, %v3293_v27 }
 0x12f   : > { %v3298_v33 = vrot.slane %v3296_v22, 1 }
 0x131   : > { %6934 = vmatmul.mubr.msk.bf16.vlgmr.msra.gmra.mrb[0].mxu0 %vm1101_vm2, %v5469_v26  ;;  %v7454_v26 = vld [vmem:[#allocation8 + $0x68] sm:$0xff]   ;;  %v3302_v41 = vor.u32 %v3301_v34, %v3298_v33 }
 0x132   : > { %6937 = vmatprep.mubr.msk.bf16.mxu0 %vm1101_vm2, %v5471_v30  ;;  %v3308_v30 = vshll.u32 %v7459_v18, 16 }
 0x134   : > { %6772 = vmatmul.mubr.msk.bf16.gmra.mrb[28].mxu1 %vm1101_vm2, %v2672_v35  ;;  %v5486_v35 = vrot.slane %v7454_v26, 3  ;;  %v3310_v38 = vrot.slane %v3308_v30, 2 }
 0x135   : > { %6775 = vmatprep.mubr.msk.bf16.mxu1 %vm1101_vm2, %v2674_v39  ;;  %v5485_v39 = vsel %vm5464_vm9, %v5482_v12, %v5484_v3 }
 0x136   : > { %v5487_v44 = vsel %vm5464_vm9, %v5484_v3, %v5486_v35  ;;  %v3311_v45 = vor.u32 %v3310_v38, %v3307_v24  ;;  %v5489_v52 = vsel %vm5464_vm9, %v5486_v35, %v5488_v46  ;;  %v8157_v3 = vld [vmem:[%s8254_s1] ss:$0 sm:$0xff] }
 0x138   : > { %v3312_v51 = vsel %vm3151_vm3, %v3302_v41, %v3311_v45 }
 0x139   : > { %6938 = vmatmul.mubr.msk.bf16.gmra.mrb[4].mxu0 %vm1101_vm2, %v5473_v43  ;;  %v3317_v43 = vshll.u32 %v7461_v36, 16 }
 0x13a   : > { %6941 = vmatprep.mubr.msk.bf16.mxu0 %vm1101_vm2, %v5475_v47  ;;  %v3303_v47 = vsel %vm3151_vm3, %v3293_v27, %v3302_v41 }
 0x13b   : > { %v3319_v49 = vrot.slane %v3317_v43, 2 }
 0x13c   : > { %6776 = vmatmul.mubr.msk.bf16.gmra.mrb[32].mxu1 %vm1101_vm2, %v2676_v13  ;;  %v7460_v13 = vld [vmem:[#allocation8 + $0x80] sm:$0xff]  }
 0x13d   : > { %6801 = vmatprep.mubr.msk.bf16.mxu1 %vm1101_vm2, %v3258_v56  ;;  %v3320_v53 = vor.u32 %v3319_v49, %v3316_v48  ;;  %v5492_v55 = vrot.slane %v7460_v13, 3 }
 0x13f   : > { %v3321_v56 = vsel %vm3151_vm3, %v3311_v45, %v3320_v53  ;;  %v5493_v6 = vsel %vm5464_vm9, %v5490_v50, %v5492_v55 }
 0x141   : > { %6942 = vmatmul.mubr.msk.bf16.gmra.mrb[8].mxu0 %vm1101_vm2, %v5477_v59  ;;  %v5495_v59 = vsel %vm5464_vm9, %v5492_v55, %v5494_v57 }
 0x142   : > { %6945 = vmatprep.mubr.msk.bf16.mxu0 %vm1101_vm2, %v5479_v2  ;;  %v7465_v2 = vld [vmem:[#allocation8 + $0xa0] ss:$0 sps:$4 sm:$0x77]  }
 0x143   : > { %v5500_v7 = vrot.slane %v7465_v2, 3 }
 0x144   : > { %6802 = vmatmul.mubr.msk.bf16.vlgmr.msra.gmra.mrb[20].mxu1 %vm1101_vm2, %v3267_v8 }
 0x145   : > { %6805 = vmatprep.mubr.msk.bf16.mxu1 %vm1101_vm2, %v3276_v15  ;;  %v5501_v9 = vsel %vm5464_vm9, %v5498_v62, %v5500_v7 }
 0x149   : > { %6946 = vmatmul.mubr.msk.bf16.gmra.mrb[12].mxu0 %vm1101_vm2, %v5481_v19 }
 0x14a   : > { %6949 = vmatprep.mubr.msk.bf16.mxu0 %vm1101_vm2, %v5483_v25 }
 0x14c   : > { %6806 = vmatmul.mubr.msk.bf16.gmra.mrb[24].mxu1 %vm1101_vm2, %v3285_v32 }
 0x14d   : > { %6809 = vmatprep.mubr.msk.bf16.mxu1 %vm1101_vm2, %v3294_v37 }
 0x151   : > { %6950 = vmatmul.mubr.msk.bf16.gmra.mrb[16].mxu0 %vm1101_vm2, %v5485_v39 }
 0x152   : > { %6953 = vmatprep.mubr.msk.bf16.mxu0 %vm1101_vm2, %v5487_v44 }
 0x154   : > { %6810 = vmatmul.mubr.msk.bf16.gmra.mrb[28].mxu1 %vm1101_vm2, %v3303_v47 }
 0x155   : > { %6813 = vmatprep.mubr.msk.bf16.mxu1 %vm1101_vm2, %v3312_v51 }
 0x159   : > { %6954 = vmatmul.mubr.msk.bf16.gmra.mrb[20].mxu0 %vm1101_vm2, %v5489_v52 }
 0x15a   : > { %6957 = vmatprep.mubr.msk.bf16.mxu0 %vm1101_vm2, %v5491_v54 }
 0x15c   : > { %6814 = vmatmul.mubr.msk.bf16.gmra.mrb[32].mxu1 %vm1101_vm2, %v3321_v56 }
 0x161   : > { %6958 = vmatmul.mubr.msk.bf16.gmra.mrb[24].mxu0 %vm1101_vm2, %v5493_v6 }
 0x162   : > { %6961 = vmatprep.mubr.msk.bf16.mxu0 %vm1101_vm2, %v5495_v59 }
 0x169   : > { %6962 = vmatmul.mubr.msk.bf16.gmra.mrb[28].mxu0 %vm1101_vm2, %v5497_v63 }
 0x16a   : > { %6965 = vmatprep.mubr.msk.bf16.mxu0 %vm1101_vm2, %v5499_v4 }
 0x171   : > { %6966 = vmatmul.mubr.msk.bf16.gmra.mrb[32].mxu0 %vm1101_vm2, %v5501_v9 }
 0x1cf   : > { %v6745_v10 = vpop.f32.mrb[0].mxu1 }
 0x1d0   : > { %v2768_v5 = vpop.f32.mrb[1].mxu1 }
 0x1d1   : > { %v6746_v8 = vpop.f32.mrb[2].mxu1 }
 0x1d2   : > { %v2771_v28 = vpop.f32.mrb[3].mxu1 }
 0x1d7   : > { %v6749_v0 = vpop.f32.mrb[4].mxu1 }
 0x1d8   : > { %v2784_v11 = vpop.f32.mrb[5].mxu1 }
 0x1d9   : > { %v6750_v12 = vpop.f32.mrb[6].mxu1 }
 0x1da   : > { %v2787_v15 = vpop.f32.mrb[7].mxu1 }
 0x1df   : > { %v6753_v16 = vpop.f32.mrb[8].mxu1 }
 0x1e0   : > { %v2800_v17 = vpop.f32.mrb[9].mxu1 }
 0x1e1   : > { %v6754_v18 = vpop.f32.mrb[10].mxu1 }
 0x1e2   : > { %v2803_v19 = vpop.f32.mrb[11].mxu1 }
 0x1e7   : > { %v8137_v21 = vpop.f32.mrb[12].mxu1 }
 0x1e8   : > { %v8139_v20 = vpop.f32.mrb[13].mxu1 }
 0x1e9   : > { %v8141_v22 = vpop.f32.mrb[14].mxu1 }
 0x1ea   : > { %v8143_v23 = vpop.f32.mrb[15].mxu1 }
 0x1ef   : > { %v8145_v25 = vpop.f32.mrb[16].mxu1 }
 0x1f0   : > { %v8147_v26 = vpop.f32.mrb[17].mxu1 }
 0x1f1   : > { %v8149_v27 = vpop.f32.mrb[18].mxu1 }
 0x1f2   : > { %v8151_v29 = vpop.f32.mrb[19].mxu1 }
 0x204   : > { %v6935_v30 = vpop.f32.mrb[0].mxu0 }
 0x205   : > { %v6971_v32 = vadd.f32 %v6935_v30, %v6745_v10  ;;  %v5593_v33 = vpop.f32.mrb[1].mxu0 }
 0x206   : > { %v6972_v34 = vadd.f32 %v5593_v33, %v2768_v5  ;;  %v6936_v36 = vpop.f32.mrb[2].mxu0 }
 0x207   : > { %v5889_v35 = vadd.f32 %v6971_v32, %v8157_v3  ;;  %v6973_v37 = vadd.f32 %v6936_v36, %v6746_v8  ;;  %v5596_v24 = vpop.f32.mrb[3].mxu0 }
 0x208   : > { %v5887_v38 = vadd.f32 %v6972_v34, %v8157_v3  ;;  %v6974_v39 = vadd.f32 %v5596_v24, %v2771_v28 }
 0x209   : > { %5925 = vst [vmem:[%s8162_s26 + $0x10] sm:$0xff] %v5889_v35  ;;  %v5890_v40 = vadd.f32 %v6973_v37, %v8157_v3 }
 0x20a   : > { %5923 = vst [vmem:[%s8162_s26] sm:$0xff] %v5887_v38  ;;  %v5888_v41 = vadd.f32 %v6974_v39, %v8157_v3 }
 0x20b   : > { %5926 = vst [vmem:[%s8162_s26 + $0x18] sm:$0xff] %v5890_v40 }
 0x20c   : > { %5924 = vst [vmem:[%s8162_s26 + $0x8] sm:$0xff] %v5888_v41  ;;  %v6939_v42 = vpop.f32.mrb[4].mxu0 }
 0x20d   : > { %v6975_v43 = vadd.f32 %v6939_v42, %v6749_v0  ;;  %v5609_v44 = vpop.f32.mrb[5].mxu0 }
 0x20e   : > { %v6976_v14 = vadd.f32 %v5609_v44, %v2784_v11  ;;  %v6940_v45 = vpop.f32.mrb[6].mxu0 }
 0x20f   : > { %v5893_v46 = vadd.f32 %v6975_v43, %v8157_v3  ;;  %v6977_v47 = vadd.f32 %v6940_v45, %v6750_v12  ;;  %v5612_v48 = vpop.f32.mrb[7].mxu0 }
 0x210   : > { %v5891_v49 = vadd.f32 %v6976_v14, %v8157_v3  ;;  %v6978_v50 = vadd.f32 %v5612_v48, %v2787_v15 }
 0x211   : > { %5929 = vst [vmem:[%s8162_s26 + $0x30] sm:$0xff] %v5893_v46  ;;  %v5894_v51 = vadd.f32 %v6977_v47, %v8157_v3 }
 0x212   : > { %5927 = vst [vmem:[%s8162_s26 + $0x20] sm:$0xff] %v5891_v49  ;;  %v5892_v52 = vadd.f32 %v6978_v50, %v8157_v3 }
 0x213   : > { %5930 = vst [vmem:[%s8162_s26 + $0x38] sm:$0xff] %v5894_v51 }
 0x214   : > { %5928 = vst [vmem:[%s8162_s26 + $0x28] sm:$0xff] %v5892_v52  ;;  %v6943_v13 = vpop.f32.mrb[8].mxu0 }
 0x215   : > { %v6979_v53 = vadd.f32 %v6943_v13, %v6753_v16  ;;  %v5625_v54 = vpop.f32.mrb[9].mxu0 }
 0x216   : > { %v6980_v31 = vadd.f32 %v5625_v54, %v2800_v17  ;;  %v6944_v55 = vpop.f32.mrb[10].mxu0 }
 0x217   : > { %v5897_v56 = vadd.f32 %v6979_v53, %v8157_v3  ;;  %v6981_v57 = vadd.f32 %v6944_v55, %v6754_v18  ;;  %v5628_v6 = vpop.f32.mrb[11].mxu0  ;;  %v6803_v60 = vpop.f32.mrb[20].mxu1 }
 0x218   : > { %v5895_v58 = vadd.f32 %v6980_v31, %v8157_v3  ;;  %v6982_v59 = vadd.f32 %v5628_v6, %v2803_v19  ;;  %v3493_v62 = vpop.f32.mrb[21].mxu1 }
 0x219   : > { %5933 = vst [vmem:[%s8162_s26 + $0x50] sm:$0xff] %v5897_v56  ;;  %v5898_v61 = vadd.f32 %v6981_v57, %v8157_v3  ;;  %v6804_v2 = vpop.f32.mrb[22].mxu1 }
 0x21a   : > { %5931 = vst [vmem:[%s8162_s26 + $0x40] sm:$0xff] %v5895_v58  ;;  %v5896_v63 = vadd.f32 %v6982_v59, %v8157_v3  ;;  %v3496_v4 = vpop.f32.mrb[23].mxu1 }
 0x21b   : > { %5934 = vst [vmem:[%s8162_s26 + $0x58] sm:$0xff] %v5898_v61 }
 0x21c   : > { %5932 = vst [vmem:[%s8162_s26 + $0x48] sm:$0xff] %v5896_v63  ;;  %v6947_v7 = vpop.f32.mrb[12].mxu0 }
 0x21d   : > { %v6983_v9 = vadd.f32 %v6947_v7, %v8137_v21  ;;  %v5641_v10 = vpop.f32.mrb[13].mxu0 }
 0x21e   : > { %v6984_v5 = vadd.f32 %v5641_v10, %v8139_v20  ;;  %v6948_v8 = vpop.f32.mrb[14].mxu0 }
 0x21f   : > { %v5901_v28 = vadd.f32 %v6983_v9, %v8157_v3  ;;  %v6985_v0 = vadd.f32 %v6948_v8, %v8141_v22  ;;  %v5644_v11 = vpop.f32.mrb[15].mxu0  ;;  %v6807_v16 = vpop.f32.mrb[24].mxu1 }
 0x220   : > { %v5899_v12 = vadd.f32 %v6984_v5, %v8157_v3  ;;  %v6986_v15 = vadd.f32 %v5644_v11, %v8143_v23  ;;  %v3509_v18 = vpop.f32.mrb[25].mxu1 }
 0x221   : > { %5937 = vst [vmem:[%s8162_s26 + $0x70] sm:$0xff] %v5901_v28  ;;  %v5902_v17 = vadd.f32 %v6985_v0, %v8157_v3  ;;  %v6808_v21 = vpop.f32.mrb[26].mxu1 }
 0x222   : > { %5935 = vst [vmem:[%s8162_s26 + $0x60] sm:$0xff] %v5899_v12  ;;  %v5900_v19 = vadd.f32 %v6986_v15, %v8157_v3  ;;  %v3512_v20 = vpop.f32.mrb[27].mxu1 }
 0x223   : > { %5938 = vst [vmem:[%s8162_s26 + $0x78] sm:$0xff] %v5902_v17 }
 0x224   : > { %5936 = vst [vmem:[%s8162_s26 + $0x68] sm:$0xff] %v5900_v19  ;;  %v6951_v22 = vpop.f32.mrb[16].mxu0 }
 0x225   : > { %v6987_v30 = vadd.f32 %v6951_v22, %v8145_v25  ;;  %v5657_v32 = vpop.f32.mrb[17].mxu0 }
 0x226   : > { %v6988_v23 = vadd.f32 %v5657_v32, %v8147_v26  ;;  %v6952_v33 = vpop.f32.mrb[18].mxu0 }
 0x227   : > { %v5905_v34 = vadd.f32 %v6987_v30, %v8157_v3  ;;  %v6989_v36 = vadd.f32 %v6952_v33, %v8149_v27  ;;  %v5660_v35 = vpop.f32.mrb[19].mxu0  ;;  %v6811_v38 = vpop.f32.mrb[28].mxu1 }
 0x228   : > { %v5903_v37 = vadd.f32 %v6988_v23, %v8157_v3  ;;  %v6990_v24 = vadd.f32 %v5660_v35, %v8151_v29  ;;  %v3525_v25 = vpop.f32.mrb[29].mxu1 }
 0x229   : > { %5941 = vst [vmem:[%s8162_s26 + $0x90] sm:$0xff] %v5905_v34  ;;  %v5906_v39 = vadd.f32 %v6989_v36, %v8157_v3  ;;  %v6812_v26 = vpop.f32.mrb[30].mxu1 }
 0x22a   : > { %5939 = vst [vmem:[%s8162_s26 + $0x80] sm:$0xff] %v5903_v37  ;;  %v5904_v40 = vadd.f32 %v6990_v24, %v8157_v3  ;;  %v3528_v41 = vpop.f32.mrb[31].mxu1 }
 0x22b   : > { %5942 = vst [vmem:[%s8162_s26 + $0x98] sm:$0xff] %v5906_v39 }
 0x22c   : > { %5940 = vst [vmem:[%s8162_s26 + $0x88] sm:$0xff] %v5904_v40  ;;  %v6955_v27 = vpop.f32.mrb[20].mxu0 }
 0x22d   : > { %v6991_v42 = vadd.f32 %v6955_v27, %v6803_v60  ;;  %v5673_v43 = vpop.f32.mrb[21].mxu0 }
 0x22e   : > { %v6992_v44 = vadd.f32 %v5673_v43, %v3493_v62  ;;  %v6956_v29 = vpop.f32.mrb[22].mxu0 }
 0x22f   : > { %v5909_v14 = vadd.f32 %v6991_v42, %v8157_v3  ;;  %v6993_v45 = vadd.f32 %v6956_v29, %v6804_v2  ;;  %v5676_v46 = vpop.f32.mrb[23].mxu0  ;;  %v6815_v49 = vpop.f32.mrb[32].mxu1 }
 0x230   : > { %v5907_v47 = vadd.f32 %v6992_v44, %v8157_v3  ;;  %v6994_v48 = vadd.f32 %v5676_v46, %v3496_v4  ;;  %v3541_v51 = vpop.f32.mrb[33].mxu1 }
 0x231   : > { %5945 = vst [vmem:[%s8162_s26 + $0xb0] sm:$0xff] %v5909_v14  ;;  %v5910_v50 = vadd.f32 %v6993_v45, %v8157_v3  ;;  %v6816_v13 = vpop.f32.mrb[34].mxu1 }
 0x232   : > { %5943 = vst [vmem:[%s8162_s26 + $0xa0] sm:$0xff] %v5907_v47  ;;  %v5908_v52 = vadd.f32 %v6994_v48, %v8157_v3  ;;  %v3544_v53 = vpop.f32.mrb[35].mxu1 }
 0x233   : > { %5946 = vst [vmem:[%s8162_s26 + $0xb8] sm:$0xff] %v5910_v50 }
 0x234   : > { %5944 = vst [vmem:[%s8162_s26 + $0xa8] sm:$0xff] %v5908_v52  ;;  %v6959_v54 = vpop.f32.mrb[24].mxu0 }
 0x235   : > { %v6995_v31 = vadd.f32 %v6959_v54, %v6807_v16  ;;  %v5689_v55 = vpop.f32.mrb[25].mxu0 }
 0x236   : > { %v6996_v56 = vadd.f32 %v5689_v55, %v3509_v18  ;;  %v6960_v57 = vpop.f32.mrb[26].mxu0 }
 0x237   : > { %v5913_v6 = vadd.f32 %v6995_v31, %v8157_v3  ;;  %v6997_v58 = vadd.f32 %v6960_v57, %v6808_v21  ;;  %v5692_v59 = vpop.f32.mrb[27].mxu0 }
 0x238   : > { %v5911_v60 = vadd.f32 %v6996_v56, %v8157_v3  ;;  %v6998_v61 = vadd.f32 %v5692_v59, %v3512_v20 }
 0x239   : > { %5949 = vst [vmem:[%s8162_s26 + $0xd0] sm:$0xff] %v5913_v6  ;;  %v5914_v62 = vadd.f32 %v6997_v58, %v8157_v3 }
 0x23a   : > { %5947 = vst [vmem:[%s8162_s26 + $0xc0] sm:$0xff] %v5911_v60  ;;  %v5912_v63 = vadd.f32 %v6998_v61, %v8157_v3 }
 0x23b   : > { %5950 = vst [vmem:[%s8162_s26 + $0xd8] sm:$0xff] %v5914_v62 }
 0x23c   : > { %5948 = vst [vmem:[%s8162_s26 + $0xc8] sm:$0xff] %v5912_v63  ;;  %v6963_v2 = vpop.f32.mrb[28].mxu0 }
 0x23d   : > { %v6999_v4 = vadd.f32 %v6963_v2, %v6811_v38  ;;  %v5705_v7 = vpop.f32.mrb[29].mxu0 }
 0x23e   : > { %v7000_v9 = vadd.f32 %v5705_v7, %v3525_v25  ;;  %v6964_v10 = vpop.f32.mrb[30].mxu0 }
 0x23f   : > { %v5917_v5 = vadd.f32 %v6999_v4, %v8157_v3  ;;  %v7001_v8 = vadd.f32 %v6964_v10, %v6812_v26  ;;  %v5708_v28 = vpop.f32.mrb[31].mxu0 }
 0x240   : > { %v5915_v0 = vadd.f32 %v7000_v9, %v8157_v3  ;;  %v7002_v11 = vadd.f32 %v5708_v28, %v3528_v41 }
 0x241   : > { %5953 = vst [vmem:[%s8162_s26 + $0xf0] sm:$0xff] %v5917_v5  ;;  %v5918_v12 = vadd.f32 %v7001_v8, %v8157_v3 }
 0x242   : > { %5951 = vst [vmem:[%s8162_s26 + $0xe0] sm:$0xff] %v5915_v0  ;;  %v5916_v15 = vadd.f32 %v7002_v11, %v8157_v3 }
 0x243   : > { %5954 = vst [vmem:[%s8162_s26 + $0xf8] sm:$0xff] %v5918_v12 }
 0x244   : > { %5952 = vst [vmem:[%s8162_s26 + $0xe8] sm:$0xff] %v5916_v15  ;;  %v6967_v16 = vpop.f32.mrb[32].mxu0 }
 0x245   : > { %v7003_v17 = vadd.f32 %v6967_v16, %v6815_v49  ;;  %v5721_v18 = vpop.f32.mrb[33].mxu0 }
 0x246   : > { %v7004_v19 = vadd.f32 %v5721_v18, %v3541_v51  ;;  %v6968_v21 = vpop.f32.mrb[34].mxu0 }
 0x247   : > { %v5921_v20 = vadd.f32 %v7003_v17, %v8157_v3  ;;  %v7005_v22 = vadd.f32 %v6968_v21, %v6816_v13  ;;  %v5724_v30 = vpop.f32.mrb[35].mxu0 }
 0x248   : > { %v5919_v32 = vadd.f32 %v7004_v19, %v8157_v3  ;;  %v7006_v23 = vadd.f32 %v5724_v30, %v3544_v53 }
 0x249   : > { %5957 = vst [vmem:[%s8162_s26 + $0x110] sm:$0xff] %v5921_v20  ;;  %v5922_v33 = vadd.f32 %v7005_v22, %v8157_v3 }
 0x24a   : > { %5955 = vst [vmem:[%s8162_s26 + $0x100] sm:$0xff] %v5919_v32  ;;  %v5920_v34 = vadd.f32 %v7006_v23, %v8157_v3 }
 0x24b   : > { %5958 = vst [vmem:[%s8162_s26 + $0x118] sm:$0xff] %v5922_v33 }
 0x24c   : > { %5956 = vst [vmem:[%s8162_s26 + $0x108] sm:$0xff] %v5920_v34 }
 0x24d PF: > { %s19_s19 = sadd.s32 1, %s7489_s19   ;;  %s8258_s17 = smov %s7485_s18 }
 0x24e   : > { %p16_p5 = scmp.ge.s32.totalorder %s19_s19, 4   ;;  %s8259_s18 = smov %s8261_s3 }
 0x250   :  { %18 = sbr.rel (!%p16_p5) target bundleno = 3 (0x3), region = 156 }

</bundles_post_ra>
